<compile_context>
chip_gen: v5e
topology: v5e:2x2
jax: 0.10.0
libtpu: 0.0.40
codegen_flags: <defaults>
</compile_context>

<pallas_src>
import functools

import jax
import jax.numpy as jnp
from jax import lax
from jax.experimental import pallas as pl
from jax.experimental.pallas import tpu as pltpu

_SQRT_HALF = 0.7071067811865476
_F32 = 4                       # bytes per float32
_MXU_DTYPE = jnp.bfloat16      # dtype of MXU operands (accumulation stays f32)


# ---------------------------------------------------------------------------
# GELU (erf-based, matching torch.nn.functional.gelu default)
# ---------------------------------------------------------------------------
def _erf(x):
    # Abramowitz & Stegun 7.1.26 rational approximation, |err| <= 1.5e-7.
    # Exact divide (kernels are HBM-bound, the divide is free).
    a1, a2, a3, a4, a5 = (0.254829592, -0.284496736, 1.421413741,
                          -1.453152027, 1.061405429)
    p = 0.3275911
    sgn = jnp.where(x >= 0.0, 1.0, -1.0)
    ax = jnp.abs(x)
    t = 1.0 / (1.0 + p * ax)
    poly = ((((a5 * t + a4) * t + a3) * t + a2) * t + a1) * t
    return sgn * (1.0 - poly * jnp.exp(-ax * ax))


def _gelu(x):
    return 0.5 * x * (1.0 + _erf(x * _SQRT_HALF))


# ---------------------------------------------------------------------------
# Generation-aware VMEM limit
# ---------------------------------------------------------------------------
@functools.lru_cache(maxsize=None)
def _vmem_cap_bytes():
    try:
        return int(pltpu.get_tpu_info().vmem_capacity_bytes)
    except Exception:
        return 64 << 20           # v7x-safe fallback (smallest physical VMEM)


def _vmem_limit(request_bytes):
    hi = (_vmem_cap_bytes() * 3) // 4      # <=48 MiB on v7x, <=96 MiB on v5e/v6e
    lo = min(32 << 20, hi)
    return int(max(min(int(request_bytes), hi), lo))


# ---------------------------------------------------------------------------
# Tiling / packing helpers
# ---------------------------------------------------------------------------
def _pack_factor(cout):
    """Channel packing so g*cout == 128 (lane-dense); 1 if it doesn't divide."""
    return 128 // cout if (0 < cout <= 128 and 128 % cout == 0) else 1


def _spec_pack(width, m1, m2):
    g = _pack_factor(width)
    m_total = 2 * m1 * m2
    while g > 1 and m_total % g:
        g //= 2
    return max(g, 1)


def _row_tiling(rows, target_steps=8, min_tile=32, max_tile=4096):
    """Packed-row tile: multiple of 8, >= ~4-8 grid steps, <= ~2 MiB/buffer."""
    t = -(-rows // target_steps)
    t = max(min_tile, min(t, max_tile))
    t = ((t + 7) // 8) * 8
    if t >= rows:                 # tiny problem: single full-extent step
        t = ((rows + 7) // 8) * 8
    padded = -(-rows // t) * t
    return t, padded - rows


def _mode_tile(mg):
    """Mode-group tile: multiple of 8 (layout-legal), prefer >=4 grid steps."""
    divs8 = [t for t in range(8, mg + 1, 8) if mg % t == 0]
    for min_steps in (4, 2, 1):
        cand = [t for t in divs8 if mg // t >= min_steps]
        if cand:
            return max(cand)
    return mg                      # full extent (always legal)


def _block_diag(w, g):
    """(Cin, Cout) -> (g*Cin, g*Cout) with g copies of w on the diagonal."""
    cin, cout = w.shape
    eye = jnp.eye(g, dtype=w.dtype)
    return jnp.einsum("io,gh->giho", w, eye).reshape(g * cin, g * cout)


def _group_block_diag(w, g):
    """(M, Ci, Co) -> (M//g, g*Ci, g*Co): g consecutive modes per block-diag."""
    m, ci, co = w.shape
    w = w.reshape(m // g, g, ci, co)
    eye = jnp.eye(g, dtype=w.dtype)
    return jnp.einsum("mgio,gh->mgiho", w, eye).reshape(m // g, g * ci, g * co)


# ---------------------------------------------------------------------------
# Pallas kernel 1: pointwise channel mix  y = x @ Wblk + b (+ residual) (+ GELU)
# (Wblk is block-diagonal -> lane-dense 128-wide in/out, K = N = 128 on MXU)
# ---------------------------------------------------------------------------
def _make_pointwise_kernel(apply_gelu, has_residual):
    def kernel(x_ref, w_ref, b_ref, *rest):
        if has_residual:
            res_ref, o_ref = rest
        else:
            (o_ref,) = rest
        y = jnp.dot(x_ref[...].astype(_MXU_DTYPE), w_ref[...],
                    preferred_element_type=jnp.float32)
        y = y + b_ref[...]                       # (1, g*Cout) broadcasts over rows
        if has_residual:
            y = y + res_ref[...]
        if apply_gelu:
            y = _gelu(y)
        o_ref[...] = y.astype(o_ref.dtype)
    return kernel


def pointwise(x2d, w_blk, b_blk, g, residual=None, apply_gelu=False):
    """x2d: (N, Cin) f32; w_blk: (g*Cin, g*Cout) bf16 block-diag; b_blk: (1, g*Cout)."""
    n_rows, _ = x2d.shape
    kp, lp = w_blk.shape
    cout = lp // g

    if n_rows % g:                                # pad to a pack multiple (rare)
        padn = g - n_rows % g
        x2d = jnp.pad(x2d, ((0, padn), (0, 0)))
        if residual is not None:
            residual = jnp.pad(residual, ((0, padn), (0, 0)))
    n_pack_src = x2d.shape[0]
    rows = n_pack_src // g
    xp = x2d.reshape(rows, kp)                    # free row-major view
    rp = residual.reshape(rows, lp) if residual is not None else None

    tile, pad = _row_tiling(rows)
    if pad:
        xp = jnp.pad(xp, ((0, pad), (0, 0)))
        if rp is not None:
            rp = jnp.pad(rp, ((0, pad), (0, 0)))
    rpad = rows + pad
    grid = rpad // tile

    in_specs = [
        pl.BlockSpec((tile, kp), lambda i: (i, 0)),
        pl.BlockSpec((kp, lp), lambda i: (0, 0)),
        pl.BlockSpec((1, lp), lambda i: (0, 0)),
    ]
    args = [xp, w_blk, b_blk]
    res_bytes = 0
    if residual is not None:
        in_specs.append(pl.BlockSpec((tile, lp), lambda i: (i, 0)))
        args.append(rp)
        res_bytes = rpad * lp * _F32

    flops = 2 * rpad * kp * lp
    transc = rpad * lp if apply_gelu else 0
    bytes_accessed = rpad * (kp + lp) * _F32 + kp * lp * 2 + lp * _F32 + res_bytes
    req = 2 * tile * (kp + 2 * lp) * _F32 + 2 * (kp + 1) * lp * 2 + (4 << 20)

    out = pl.pallas_call(
        _make_pointwise_kernel(apply_gelu, residual is not None),
        grid=(grid,),
        in_specs=in_specs,
        out_specs=pl.BlockSpec((tile, lp), lambda i: (i, 0)),
        out_shape=jax.ShapeDtypeStruct((rpad, lp), jnp.float32),
        compiler_params=pltpu.CompilerParams(
            dimension_semantics=("parallel",), vmem_limit_bytes=_vmem_limit(req)),
        cost_estimate=pl.CostEstimate(flops=flops, transcendentals=transc,
                                      bytes_accessed=bytes_accessed),
    )(*args)
    return out[:rows].reshape(n_pack_src, cout)[:n_rows]


# ---------------------------------------------------------------------------
# Pallas kernel 2: fused projection head  y = gelu(x @ W1 + b1) @ W2 + b2
# (the g*64-wide intermediate stays in VMEM/vregs, never written to HBM)
# ---------------------------------------------------------------------------
def _head_kernel(x_ref, w1_ref, b1_ref, w2_ref, b2_ref, o_ref):
    h = jnp.dot(x_ref[...].astype(_MXU_DTYPE), w1_ref[...],
                preferred_element_type=jnp.float32)
    h = _gelu(h + b1_ref[...])
    y = jnp.dot(h.astype(_MXU_DTYPE), w2_ref[...],
                preferred_element_type=jnp.float32) + b2_ref[...]
    o_ref[...] = y.astype(o_ref.dtype)


def fused_head(x2d, w1_blk, b1_blk, w2_blk, b2_blk, g):
    n_rows, _ = x2d.shape
    kp, hp = w1_blk.shape
    _, op = w2_blk.shape
    cout = op // g

    if n_rows % g:
        x2d = jnp.pad(x2d, ((0, g - n_rows % g), (0, 0)))
    n_pack_src = x2d.shape[0]
    rows = n_pack_src // g
    xp = x2d.reshape(rows, kp)

    tile, pad = _row_tiling(rows)
    if pad:
        xp = jnp.pad(xp, ((0, pad), (0, 0)))
    rpad = rows + pad
    grid = rpad // tile

    flops = 2 * rpad * (kp * hp + hp * op)
    bytes_accessed = rpad * (kp + op) * _F32 + (kp * hp + hp * op) * 2 + (hp + op) * _F32
    req = 2 * tile * (kp + op) * _F32 + tile * hp * _F32 + 2 * (kp * hp + hp * op) * 2 + (4 << 20)

    # TODO(synk): the final output is only g*2 = 8 lanes wide (masked store);
    # making it 128-wide would need a 64x block-diag weight inflation on fc2,
    # and the output array is tiny, so it is left as-is.
    out = pl.pallas_call(
        _head_kernel,
        grid=(grid,),
        in_specs=[
            pl.BlockSpec((tile, kp), lambda i: (i, 0)),
            pl.BlockSpec((kp, hp), lambda i: (0, 0)),
            pl.BlockSpec((1, hp), lambda i: (0, 0)),
            pl.BlockSpec((hp, op), lambda i: (0, 0)),
            pl.BlockSpec((1, op), lambda i: (0, 0)),
        ],
        out_specs=pl.BlockSpec((tile, op), lambda i: (i, 0)),
        out_shape=jax.ShapeDtypeStruct((rpad, op), jnp.float32),
        compiler_params=pltpu.CompilerParams(
            dimension_semantics=("parallel",), vmem_limit_bytes=_vmem_limit(req)),
        cost_estimate=pl.CostEstimate(flops=flops, transcendentals=rpad * hp,
                                      bytes_accessed=bytes_accessed),
    )(xp, w1_blk, b1_blk, w2_blk, b2_blk)
    return out[:rows].reshape(n_pack_src, cout)[:n_rows]


# ---------------------------------------------------------------------------
# Pallas kernel 3: spectral mode-mix (SpectralConv2d core) on the MXU.
#   Per mode-group of G modes: LHS = [Xr ; Xi] (2B rows, G*Ci = 128 lanes),
#   W block-diagonal (128, 128).  Two batched dots per group:
#     Pr = LHS @ Wr, Pi = LHS @ Wi
#     out_r = Pr[:B] - Pi[B:],  out_i = Pi[:B] + Pr[B:]
# ---------------------------------------------------------------------------
def _spectral_kernel(lhs_ref, wr_ref, wi_ref, or_ref, oi_ref):
    a = lhs_ref[...].astype(_MXU_DTYPE)          # (TMg, 2B, 128)
    nb = a.shape[1] // 2
    dn = (((2,), (1,)), ((0,), (0,)))            # contract lanes, batch over groups
    pr = lax.dot_general(a, wr_ref[...], dn, preferred_element_type=jnp.float32)
    pi = lax.dot_general(a, wi_ref[...], dn, preferred_element_type=jnp.float32)
    or_ref[...] = pr[:, :nb, :] - pi[:, nb:, :]  # real part, (TMg, B, 128)
    oi_ref[...] = pi[:, :nb, :] + pr[:, nb:, :]  # imag part


def spectral_conv2d(v, wr_blk, wi_blk, m1, m2):
    """SpectralConv2d in NHWC.  v: (B, S, S, Ci) f32 -> (B, S, S, Co) f32.

    wr_blk/wi_blk: (Mg, G*Ci, G*Co) bf16 block-diag weights (built at init),
    mode ordering = [top corner ; bottom corner], G consecutive modes per group.
    """
    B, S1, S2, Ci = v.shape
    Sh = S2 // 2 + 1
    Mg, gci, gco = wr_blk.shape
    G = gci // Ci
    Co = gco // G
    M = 2 * m1 * m2
    assert Mg * G == M and 2 * m1 <= S1 and m2 <= Sh, "mode corners exceed spectrum"

    # TODO(synk): rfft2/irfft2 have no Pallas primitive; FFT stays in plain JAX.
    x_ft = jnp.fft.rfft2(v, axes=(1, 2))                         # (B, S1, Sh, Ci) c64
    corners = jnp.concatenate(
        [x_ft[:, :m1, :m2, :], x_ft[:, S1 - m1:, :m2, :]], axis=1)  # (B, 2*m1, m2, Ci)
    corners = corners.reshape(B, Mg, gci)                        # free view
    lhs = jnp.stack([jnp.real(corners), jnp.imag(corners)], axis=0)   # (2, B, Mg, 128)
    lhs = lhs.transpose(2, 0, 1, 3).reshape(Mg, 2 * B, gci).astype(jnp.float32)

    TMg = _mode_tile(Mg)
    grid = Mg // TMg
    flops = 2 * Mg * 2 * (2 * B) * gci * gco
    bytes_accessed = (2 * B * Mg * gci * _F32 + 2 * Mg * gci * gco * 2
                      + 2 * B * Mg * gco * _F32)
    req = 2 * (2 * B * TMg * gci * _F32 + 2 * TMg * gci * gco * 2
               + 2 * B * TMg * gco * _F32) + (4 << 20)

    o_r, o_i = pl.pallas_call(
        _spectral_kernel,
        grid=(grid,),
        in_specs=[
            pl.BlockSpec((TMg, 2 * B, gci), lambda i: (i, 0, 0)),
            pl.BlockSpec((TMg, gci, gco), lambda i: (i, 0, 0)),
            pl.BlockSpec((TMg, gci, gco), lambda i: (i, 0, 0)),
        ],
        out_specs=(pl.BlockSpec((TMg, B, gco), lambda i: (i, 0, 0)),
                   pl.BlockSpec((TMg, B, gco), lambda i: (i, 0, 0))),
        out_shape=(jax.ShapeDtypeStruct((Mg, B, gco), jnp.float32),
                   jax.ShapeDtypeStruct((Mg, B, gco), jnp.float32)),
        compiler_params=pltpu.CompilerParams(
            dimension_semantics=("parallel",), vmem_limit_bytes=_vmem_limit(req)),
        cost_estimate=pl.CostEstimate(flops=flops, transcendentals=0,
                                      bytes_accessed=bytes_accessed),
    )(lhs, wr_blk, wi_blk)

    out_c = lax.complex(o_r, o_i).transpose(1, 0, 2).reshape(B, 2 * m1, m2, Co)
    # Zero-fill the rest of the spectrum via pad/concat (fuses better than
    # zeros + .at[].set scatters).
    out_c = jnp.pad(out_c, ((0, 0), (0, 0), (0, Sh - m2), (0, 0)))
    mid = jnp.zeros((B, S1 - 2 * m1, Sh, Co), out_c.dtype)
    out_ft = jnp.concatenate([out_c[:, :m1], mid, out_c[:, m1:]], axis=1)
    return jnp.fft.irfft2(out_ft, s=(S1, S2), axes=(1, 2)).astype(jnp.float32)


# ---------------------------------------------------------------------------
# FNO2d forward
# ---------------------------------------------------------------------------
@functools.partial(jax.jit, static_argnames=("m1", "m2", "width"))
def fno2d_forward(params, h, xgrid, *, m1, m2, width):
    g = _pack_factor(width)
    inp = jnp.concatenate([h, xgrid], axis=-1)                   # (B, S, S, 4)
    B, S1, S2, Cin = inp.shape
    N = B * S1 * S2

    v = pointwise(inp.reshape(N, Cin), params["fc0_w"], params["fc0_b"], g)
    v = v.reshape(B, S1, S2, width)

    # three Fourier layers: x = gelu(SpectralConv(x) + Conv1x1(x)); last has no gelu
    for name, act in (("0", True), ("1", True), ("3", False)):
        spec = spectral_conv2d(v, params[f"conv{name}_wr"],
                               params[f"conv{name}_wi"], m1, m2)
        v = pointwise(v.reshape(N, width),
                      params[f"w{name}_w"], params[f"w{name}_b"], g,
                      residual=spec.reshape(N, width), apply_gelu=act)
        v = v.reshape(B, S1, S2, width)

    # fc1 (GELU) + fc2 fused: the wide intermediate never hits HBM.
    out = fused_head(v.reshape(N, width), params["fc1_w"], params["fc1_b"],
                     params["fc2_w"], params["fc2_b"], g)
    return out.reshape(B, S1, S2, 2)


# ---------------------------------------------------------------------------
# deterministic synthetic parameter init (shapes match the PyTorch module;
# all block-diagonal / re-laid-out weights built ONCE here)
# ---------------------------------------------------------------------------
def init_params(key, width, m1, m2):
    g = _pack_factor(width)
    G = _spec_pack(width, m1, m2)
    keys = iter(jax.random.split(key, 64))

    def lin(cin, cout, pack):
        bound = 1.0 / (cin ** 0.5)
        w = jax.random.uniform(next(keys), (cin, cout), jnp.float32, -bound, bound)
        b = jax.random.uniform(next(keys), (cout,), jnp.float32, -bound, bound)
        w_blk = _block_diag(w, pack).astype(_MXU_DTYPE)
        b_blk = jnp.tile(b, pack).reshape(1, pack * cout).astype(jnp.float32)
        return w_blk, b_blk

    def spectral_weights(ci, co):
        scale = 1.0 / (ci * co)
        parts_r, parts_i = [], []
        for _ in range(2):  # weights1 (top corner), weights2 (bottom corner)
            # generated in torch layout (ci, co, m1, m2) like torch.rand(cfloat),
            # then re-laid out ONCE to (M, ci, co) and grouped block-diagonally.
            wr = scale * jax.random.uniform(next(keys), (ci, co, m1, m2), jnp.float32)
            wi = scale * jax.random.uniform(next(keys), (ci, co, m1, m2), jnp.float32)
            parts_r.append(jnp.transpose(wr, (2, 3, 0, 1)).reshape(m1 * m2, ci, co))
            parts_i.append(jnp.transpose(wi, (2, 3, 0, 1)).reshape(m1 * m2, ci, co))
        wr = jnp.concatenate(parts_r, axis=0)
        wi = jnp.concatenate(parts_i, axis=0)
        return (_group_block_diag(wr, G).astype(_MXU_DTYPE),
                _group_block_diag(wi, G).astype(_MXU_DTYPE))

    params = {}
    params["fc0_w"], params["fc0_b"] = lin(4, width, g)
    for name in ("0", "1", "3"):
        params[f"conv{name}_wr"], params[f"conv{name}_wi"] = spectral_weights(width, width)
        params[f"w{name}_w"], params[f"w{name}_b"] = lin(width, width, g)
    params["fc1_w"], params["fc1_b"] = lin(width, 64, g)
    params["fc2_w"], params["fc2_b"] = lin(64, 2, g)
    return params


if __name__ == "__main__":
    B, S, width, m1, m2 = 2, 16, 32, 8, 8
    key = jax.random.PRNGKey(0)
    k_p, k_h, k_x = jax.random.split(key, 3)

    params = init_params(k_p, width, m1, m2)
    # fc0 takes 4 input channels -> h carries 2 field channels, xgrid carries (x, y)
    h = jax.random.normal(k_h, (B, S, S, 2), jnp.float32)
    xgrid = jax.random.normal(k_x, (B, S, S, 2), jnp.float32)

    out = fno2d_forward(params, h, xgrid, m1=m1, m2=m2, width=width)
    out = jax.block_until_ready(out)
    assert out.shape == (B, S, S, 2) and out.dtype == jnp.float32
    assert bool(jnp.all(jnp.isfinite(out)))
    print("KERNEL_OK")
</pallas_src>

<mosaic_0001>
module attributes {stable_mosaic.version = 11 : i64} {
  func.func @kernel(%arg0: i32, %arg1: memref<32x16xf32, #tpu.memory_space<vmem>>, %arg2: memref<16x128xbf16, #tpu.memory_space<vmem>>, %arg3: memref<1x128xf32, #tpu.memory_space<vmem>>, %arg4: memref<32x128xf32, #tpu.memory_space<vmem>>) attributes {dimension_semantics = [#tpu.dimension_semantics<parallel>], iteration_bounds = array<i64: 4>, scalar_prefetch = 0 : i64, scratch_operands = 0 : i64, tpu.core_type = #tpu.core_type<tc>, window_params = [{transform_indices = @transform_0, window_bounds = array<i64: 32, 16>}, {pipeline_mode = #tpu.pipeline_mode<synchronous>, transform_indices = @transform_1, window_bounds = array<i64: 16, 128>}, {pipeline_mode = #tpu.pipeline_mode<synchronous>, transform_indices = @transform_2, window_bounds = array<i64: 1, 128>}, {transform_indices = @transform_3, window_bounds = array<i64: 32, 128>}]} {
    %c0 = arith.constant 0 : index
    %c0_0 = arith.constant 0 : index
    %0 = vector.load %arg1[%c0, %c0_0] : memref<32x16xf32, #tpu.memory_space<vmem>>, vector<32x16xf32>
    %1 = arith.truncf %0 : vector<32x16xf32> to vector<32x16xbf16>
    %c0_1 = arith.constant 0 : index
    %c0_2 = arith.constant 0 : index
    %2 = vector.load %arg2[%c0_1, %c0_2] : memref<16x128xbf16, #tpu.memory_space<vmem>>, vector<16x128xbf16>
    %cst = arith.constant dense<0.000000e+00> : vector<32x128xf32>
    %3 = tpu.matmul %1, %2, %cst {dimension_numbers = #tpu.dot_dimension_numbers<[1], [0], [0], [1], [0, 0, 1, 1], [], []>} : vector<32x16xbf16>, vector<16x128xbf16>, vector<32x128xf32> -> vector<32x128xf32>
    %c0_3 = arith.constant 0 : index
    %c0_4 = arith.constant 0 : index
    %4 = vector.load %arg3[%c0_3, %c0_4] : memref<1x128xf32, #tpu.memory_space<vmem>>, vector<1x128xf32>
    %5 = vector.broadcast %4 : vector<1x128xf32> to vector<32x128xf32>
    %6 = arith.addf %3, %5 : vector<32x128xf32>
    %c0_5 = arith.constant 0 : index
    %c0_6 = arith.constant 0 : index
    %7 = vector.load %arg4[%c0_5, %c0_6] : memref<32x128xf32, #tpu.memory_space<vmem>>, vector<32x128xf32>
    tpu.vector_store %arg4[%c0_5, %c0_6], %6 {strides = array<i32>} : memref<32x128xf32, #tpu.memory_space<vmem>>, vector<32x128xf32>,
    return
  }
  func.func @transform_0(%arg0: i32) -> (i32, i32) {
    %c0_i32 = arith.constant 0 : i32
    %c0_i32_0 = arith.constant 0 : i32
    return %arg0, %c0_i32 : i32, i32
  }
  func.func @transform_1(%arg0: i32) -> (i32, i32) {
    %c0_i32 = arith.constant 0 : i32
    %c0_i32_0 = arith.constant 0 : i32
    %c0_i32_1 = arith.constant 0 : i32
    return %c0_i32, %c0_i32_0 : i32, i32
  }
  func.func @transform_2(%arg0: i32) -> (i32, i32) {
    %c0_i32 = arith.constant 0 : i32
    %c0_i32_0 = arith.constant 0 : i32
    %c0_i32_1 = arith.constant 0 : i32
    return %c0_i32, %c0_i32_0 : i32, i32
  }
  func.func @transform_3(%arg0: i32) -> (i32, i32) {
    %c0_i32 = arith.constant 0 : i32
    %c0_i32_0 = arith.constant 0 : i32
    return %arg0, %c0_i32 : i32, i32
  }
}

module attributes {stable_mosaic.version = 11 : i64} {
  func.func @_spectral_kernel(%arg0: i32, %arg1: memref<8x4x128xf32, #tpu.memory_space<vmem>>, %arg2: memref<8x128x128xbf16, #tpu.memory_space<vmem>>, %arg3: memref<8x128x128xbf16, #tpu.memory_space<vmem>>, %arg4: memref<8x2x128xf32, #tpu.memory_space<vmem>>, %arg5: memref<8x2x128xf32, #tpu.memory_space<vmem>>) attributes {dimension_semantics = [#tpu.dimension_semantics<parallel>], iteration_bounds = array<i64: 4>, scalar_prefetch = 0 : i64, scratch_operands = 0 : i64, tpu.core_type = #tpu.core_type<tc>, window_params = [{transform_indices = @transform_0, window_bounds = array<i64: 8, 4, 128>}, {transform_indices = @transform_1, window_bounds = array<i64: 8, 128, 128>}, {transform_indices = @transform_2, window_bounds = array<i64: 8, 128, 128>}, {transform_indices = @transform_3, window_bounds = array<i64: 8, 2, 128>}, {transform_indices = @transform_4, window_bounds = array<i64: 8, 2, 128>}]} {
    %c0 = arith.constant 0 : index
    %c0_0 = arith.constant 0 : index
    %c0_1 = arith.constant 0 : index
    %0 = vector.load %arg1[%c0, %c0_0, %c0_1] : memref<8x4x128xf32, #tpu.memory_space<vmem>>, vector<8x4x128xf32>
    %1 = arith.truncf %0 : vector<8x4x128xf32> to vector<8x4x128xbf16>
    %c0_2 = arith.constant 0 : index
    %c0_3 = arith.constant 0 : index
    %c0_4 = arith.constant 0 : index
    %2 = vector.load %arg2[%c0_2, %c0_3, %c0_4] : memref<8x128x128xbf16, #tpu.memory_space<vmem>>, vector<8x128x128xbf16>
    %cst = arith.constant dense<0.000000e+00> : vector<8x4x128xf32>
    %3 = tpu.matmul %1, %2, %cst {dimension_numbers = #tpu.dot_dimension_numbers<[2], [1], [1], [2], [0, 0, 0, 1, 1, 2], [0], [0]>} : vector<8x4x128xbf16>, vector<8x128x128xbf16>, vector<8x4x128xf32> -> vector<8x4x128xf32>
    %c0_5 = arith.constant 0 : index
    %c0_6 = arith.constant 0 : index
    %c0_7 = arith.constant 0 : index
    %4 = vector.load %arg3[%c0_5, %c0_6, %c0_7] : memref<8x128x128xbf16, #tpu.memory_space<vmem>>, vector<8x128x128xbf16>
    %cst_8 = arith.constant dense<0.000000e+00> : vector<8x4x128xf32>
    %5 = tpu.matmul %1, %4, %cst_8 {dimension_numbers = #tpu.dot_dimension_numbers<[2], [1], [1], [2], [0, 0, 0, 1, 1, 2], [0], [0]>} : vector<8x4x128xbf16>, vector<8x128x128xbf16>, vector<8x4x128xf32> -> vector<8x4x128xf32>
    %6 = vector.extract_strided_slice %3 {offsets = [0, 0, 0], sizes = [8, 2, 128], strides = [1, 1, 1]} : vector<8x4x128xf32> to vector<8x2x128xf32>
    %7 = vector.extract_strided_slice %5 {offsets = [0, 2, 0], sizes = [8, 2, 128], strides = [1, 1, 1]} : vector<8x4x128xf32> to vector<8x2x128xf32>
    %8 = arith.subf %6, %7 : vector<8x2x128xf32>
    %c0_9 = arith.constant 0 : index
    %c0_10 = arith.constant 0 : index
    %c0_11 = arith.constant 0 : index
    %9 = vector.load %arg4[%c0_9, %c0_10, %c0_11] : memref<8x2x128xf32, #tpu.memory_space<vmem>>, vector<8x2x128xf32>
    tpu.vector_store %arg4[%c0_9, %c0_10, %c0_11], %8 {strides = array<i32>} : memref<8x2x128xf32, #tpu.memory_space<vmem>>, vector<8x2x128xf32>,
    %10 = vector.extract_strided_slice %5 {offsets = [0, 0, 0], sizes = [8, 2, 128], strides = [1, 1, 1]} : vector<8x4x128xf32> to vector<8x2x128xf32>
    %11 = vector.extract_strided_slice %3 {offsets = [0, 2, 0], sizes = [8, 2, 128], strides = [1, 1, 1]} : vector<8x4x128xf32> to vector<8x2x128xf32>
    %12 = arith.addf %10, %11 : vector<8x2x128xf32>
    %c0_12 = arith.constant 0 : index
    %c0_13 = arith.constant 0 : index
    %c0_14 = arith.constant 0 : index
    %13 = vector.load %arg5[%c0_12, %c0_13, %c0_14] : memref<8x2x128xf32, #tpu.memory_space<vmem>>, vector<8x2x128xf32>
    tpu.vector_store %arg5[%c0_12, %c0_13, %c0_14], %12 {strides = array<i32>} : memref<8x2x128xf32, #tpu.memory_space<vmem>>, vector<8x2x128xf32>,
    return
  }
  func.func @transform_0(%arg0: i32) -> (i32, i32, i32) {
    %c0_i32 = arith.constant 0 : i32
    %c0_i32_0 = arith.constant 0 : i32
    %c0_i32_1 = arith.constant 0 : i32
    return %arg0, %c0_i32, %c0_i32_0 : i32, i32, i32
  }
  func.func @transform_1(%arg0: i32) -> (i32, i32, i32) {
    %c0_i32 = arith.constant 0 : i32
    %c0_i32_0 = arith.constant 0 : i32
    %c0_i32_1 = arith.constant 0 : i32
    return %arg0, %c0_i32, %c0_i32_0 : i32, i32, i32
  }
  func.func @transform_2(%arg0: i32) -> (i32, i32, i32) {
    %c0_i32 = arith.constant 0 : i32
    %c0_i32_0 = arith.constant 0 : i32
    %c0_i32_1 = arith.constant 0 : i32
    return %arg0, %c0_i32, %c0_i32_0 : i32, i32, i32
  }
  func.func @transform_3(%arg0: i32) -> (i32, i32, i32) {
    %c0_i32 = arith.constant 0 : i32
    %c0_i32_0 = arith.constant 0 : i32
    %c0_i32_1 = arith.constant 0 : i32
    return %arg0, %c0_i32, %c0_i32_0 : i32, i32, i32
  }
  func.func @transform_4(%arg0: i32) -> (i32, i32, i32) {
    %c0_i32 = arith.constant 0 : i32
    %c0_i32_0 = arith.constant 0 : i32
    %c0_i32_1 = arith.constant 0 : i32
    return %arg0, %c0_i32, %c0_i32_0 : i32, i32, i32
  }
}

module attributes {stable_mosaic.version = 11 : i64} {
  func.func @kernel(%arg0: i32, %arg1: memref<32x128xf32, #tpu.memory_space<vmem>>, %arg2: memref<128x128xbf16, #tpu.memory_space<vmem>>, %arg3: memref<1x128xf32, #tpu.memory_space<vmem>>, %arg4: memref<32x128xf32, #tpu.memory_space<vmem>>, %arg5: memref<32x128xf32, #tpu.memory_space<vmem>>) attributes {dimension_semantics = [#tpu.dimension_semantics<parallel>], iteration_bounds = array<i64: 4>, scalar_prefetch = 0 : i64, scratch_operands = 0 : i64, tpu.core_type = #tpu.core_type<tc>, window_params = [{transform_indices = @transform_0, window_bounds = array<i64: 32, 128>}, {pipeline_mode = #tpu.pipeline_mode<synchronous>, transform_indices = @transform_1, window_bounds = array<i64: 128, 128>}, {pipeline_mode = #tpu.pipeline_mode<synchronous>, transform_indices = @transform_2, window_bounds = array<i64: 1, 128>}, {transform_indices = @transform_3, window_bounds = array<i64: 32, 128>}, {transform_indices = @transform_4, window_bounds = array<i64: 32, 128>}]} {
    %c0 = arith.constant 0 : index
    %c0_0 = arith.constant 0 : index
    %0 = vector.load %arg1[%c0, %c0_0] : memref<32x128xf32, #tpu.memory_space<vmem>>, vector<32x128xf32>
    %1 = arith.truncf %0 : vector<32x128xf32> to vector<32x128xbf16>
    %c0_1 = arith.constant 0 : index
    %c0_2 = arith.constant 0 : index
    %2 = vector.load %arg2[%c0_1, %c0_2] : memref<128x128xbf16, #tpu.memory_space<vmem>>, vector<128x128xbf16>
    %cst = arith.constant dense<0.000000e+00> : vector<32x128xf32>
    %3 = tpu.matmul %1, %2, %cst {dimension_numbers = #tpu.dot_dimension_numbers<[1], [0], [0], [1], [0, 0, 1, 1], [], []>} : vector<32x128xbf16>, vector<128x128xbf16>, vector<32x128xf32> -> vector<32x128xf32>
    %c0_3 = arith.constant 0 : index
    %c0_4 = arith.constant 0 : index
    %4 = vector.load %arg3[%c0_3, %c0_4] : memref<1x128xf32, #tpu.memory_space<vmem>>, vector<1x128xf32>
    %5 = vector.broadcast %4 : vector<1x128xf32> to vector<32x128xf32>
    %6 = arith.addf %3, %5 : vector<32x128xf32>
    %c0_5 = arith.constant 0 : index
    %c0_6 = arith.constant 0 : index
    %7 = vector.load %arg4[%c0_5, %c0_6] : memref<32x128xf32, #tpu.memory_space<vmem>>, vector<32x128xf32>
    %8 = arith.addf %6, %7 : vector<32x128xf32>
    %cst_7 = arith.constant 5.000000e-01 : f32
    %9 = vector.broadcast %cst_7 : f32 to vector<32x128xf32>
    %10 = arith.mulf %9, %8 : vector<32x128xf32>
    %cst_8 = arith.constant 0.707106769 : f32
    %11 = vector.broadcast %cst_8 : f32 to vector<32x128xf32>
    %12 = arith.mulf %8, %11 : vector<32x128xf32>
    %cst_9 = arith.constant 0.000000e+00 : f32
    %13 = vector.broadcast %cst_9 : f32 to vector<32x128xf32>
    %14 = arith.cmpf oge, %12, %13 : vector<32x128xf32>
    %cst_10 = arith.constant 1.000000e+00 : f32
    %cst_11 = arith.constant -1.000000e+00 : f32
    %15 = vector.broadcast %cst_10 : f32 to vector<32x128xf32>
    %16 = vector.broadcast %cst_11 : f32 to vector<32x128xf32>
    %17 = arith.select %14, %15, %16 : vector<32x128xi1>, vector<32x128xf32>
    %18 = math.absf %12 : vector<32x128xf32>
    %cst_12 = arith.constant 0.327591091 : f32
    %19 = vector.broadcast %cst_12 : f32 to vector<32x128xf32>
    %20 = arith.mulf %19, %18 : vector<32x128xf32>
    %cst_13 = arith.constant 1.000000e+00 : f32
    %21 = vector.broadcast %cst_13 : f32 to vector<32x128xf32>
    %22 = arith.addf %21, %20 : vector<32x128xf32>
    %cst_14 = arith.constant 1.000000e+00 : f32
    %23 = vector.broadcast %cst_14 : f32 to vector<32x128xf32>
    %24 = arith.divf %23, %22 : vector<32x128xf32>
    %cst_15 = arith.constant 1.06140542 : f32
    %25 = vector.broadcast %cst_15 : f32 to vector<32x128xf32>
    %26 = arith.mulf %25, %24 : vector<32x128xf32>
    %cst_16 = arith.constant -1.45315206 : f32
    %27 = vector.broadcast %cst_16 : f32 to vector<32x128xf32>
    %28 = arith.addf %26, %27 : vector<32x128xf32>
    %29 = arith.mulf %28, %24 : vector<32x128xf32>
    %cst_17 = arith.constant 1.42141378 : f32
    %30 = vector.broadcast %cst_17 : f32 to vector<32x128xf32>
    %31 = arith.addf %29, %30 : vector<32x128xf32>
    %32 = arith.mulf %31, %24 : vector<32x128xf32>
    %cst_18 = arith.constant -0.284496725 : f32
    %33 = vector.broadcast %cst_18 : f32 to vector<32x128xf32>
    %34 = arith.addf %32, %33 : vector<32x128xf32>
    %35 = arith.mulf %34, %24 : vector<32x128xf32>
    %cst_19 = arith.constant 0.254829586 : f32
    %36 = vector.broadcast %cst_19 : f32 to vector<32x128xf32>
    %37 = arith.addf %35, %36 : vector<32x128xf32>
    %38 = arith.mulf %37, %24 : vector<32x128xf32>
    %cst_20 = arith.constant 0.000000e+00 : f32
    %39 = vector.broadcast %cst_20 : f32 to vector<32x128xf32>
    %40 = arith.subf %39, %18 : vector<32x128xf32>
    %41 = arith.mulf %40, %18 : vector<32x128xf32>
    %42 = math.exp %41 : vector<32x128xf32>
    %43 = arith.mulf %38, %42 : vector<32x128xf32>
    %cst_21 = arith.constant 1.000000e+00 : f32
    %44 = vector.broadcast %cst_21 : f32 to vector<32x128xf32>
    %45 = arith.subf %44, %43 : vector<32x128xf32>
    %46 = arith.mulf %17, %45 : vector<32x128xf32>
    %cst_22 = arith.constant 1.000000e+00 : f32
    %47 = vector.broadcast %cst_22 : f32 to vector<32x128xf32>
    %48 = arith.addf %47, %46 : vector<32x128xf32>
    %49 = arith.mulf %10, %48 : vector<32x128xf32>
    %c0_23 = arith.constant 0 : index
    %c0_24 = arith.constant 0 : index
    %50 = vector.load %arg5[%c0_23, %c0_24] : memref<32x128xf32, #tpu.memory_space<vmem>>, vector<32x128xf32>
    tpu.vector_store %arg5[%c0_23, %c0_24], %49 {strides = array<i32>} : memref<32x128xf32, #tpu.memory_space<vmem>>, vector<32x128xf32>,
    return
  }
  func.func @transform_0(%arg0: i32) -> (i32, i32) {
    %c0_i32 = arith.constant 0 : i32
    %c0_i32_0 = arith.constant 0 : i32
    return %arg0, %c0_i32 : i32, i32
  }
  func.func @transform_1(%arg0: i32) -> (i32, i32) {
    %c0_i32 = arith.constant 0 : i32
    %c0_i32_0 = arith.constant 0 : i32
    %c0_i32_1 = arith.constant 0 : i32
    return %c0_i32, %c0_i32_0 : i32, i32
  }
  func.func @transform_2(%arg0: i32) -> (i32, i32) {
    %c0_i32 = arith.constant 0 : i32
    %c0_i32_0 = arith.constant 0 : i32
    %c0_i32_1 = arith.constant 0 : i32
    return %c0_i32, %c0_i32_0 : i32, i32
  }
  func.func @transform_3(%arg0: i32) -> (i32, i32) {
    %c0_i32 = arith.constant 0 : i32
    %c0_i32_0 = arith.constant 0 : i32
    return %arg0, %c0_i32 : i32, i32
  }
  func.func @transform_4(%arg0: i32) -> (i32, i32) {
    %c0_i32 = arith.constant 0 : i32
    %c0_i32_0 = arith.constant 0 : i32
    return %arg0, %c0_i32 : i32, i32
  }
}

module attributes {stable_mosaic.version = 11 : i64} {
  func.func @kernel(%arg0: i32, %arg1: memref<32x128xf32, #tpu.memory_space<vmem>>, %arg2: memref<128x128xbf16, #tpu.memory_space<vmem>>, %arg3: memref<1x128xf32, #tpu.memory_space<vmem>>, %arg4: memref<32x128xf32, #tpu.memory_space<vmem>>, %arg5: memref<32x128xf32, #tpu.memory_space<vmem>>) attributes {dimension_semantics = [#tpu.dimension_semantics<parallel>], iteration_bounds = array<i64: 4>, scalar_prefetch = 0 : i64, scratch_operands = 0 : i64, tpu.core_type = #tpu.core_type<tc>, window_params = [{transform_indices = @transform_0, window_bounds = array<i64: 32, 128>}, {pipeline_mode = #tpu.pipeline_mode<synchronous>, transform_indices = @transform_1, window_bounds = array<i64: 128, 128>}, {pipeline_mode = #tpu.pipeline_mode<synchronous>, transform_indices = @transform_2, window_bounds = array<i64: 1, 128>}, {transform_indices = @transform_3, window_bounds = array<i64: 32, 128>}, {transform_indices = @transform_4, window_bounds = array<i64: 32, 128>}]} {
    %c0 = arith.constant 0 : index
    %c0_0 = arith.constant 0 : index
    %0 = vector.load %arg1[%c0, %c0_0] : memref<32x128xf32, #tpu.memory_space<vmem>>, vector<32x128xf32>
    %1 = arith.truncf %0 : vector<32x128xf32> to vector<32x128xbf16>
    %c0_1 = arith.constant 0 : index
    %c0_2 = arith.constant 0 : index
    %2 = vector.load %arg2[%c0_1, %c0_2] : memref<128x128xbf16, #tpu.memory_space<vmem>>, vector<128x128xbf16>
    %cst = arith.constant dense<0.000000e+00> : vector<32x128xf32>
    %3 = tpu.matmul %1, %2, %cst {dimension_numbers = #tpu.dot_dimension_numbers<[1], [0], [0], [1], [0, 0, 1, 1], [], []>} : vector<32x128xbf16>, vector<128x128xbf16>, vector<32x128xf32> -> vector<32x128xf32>
    %c0_3 = arith.constant 0 : index
    %c0_4 = arith.constant 0 : index
    %4 = vector.load %arg3[%c0_3, %c0_4] : memref<1x128xf32, #tpu.memory_space<vmem>>, vector<1x128xf32>
    %5 = vector.broadcast %4 : vector<1x128xf32> to vector<32x128xf32>
    %6 = arith.addf %3, %5 : vector<32x128xf32>
    %c0_5 = arith.constant 0 : index
    %c0_6 = arith.constant 0 : index
    %7 = vector.load %arg4[%c0_5, %c0_6] : memref<32x128xf32, #tpu.memory_space<vmem>>, vector<32x128xf32>
    %8 = arith.addf %6, %7 : vector<32x128xf32>
    %c0_7 = arith.constant 0 : index
    %c0_8 = arith.constant 0 : index
    %9 = vector.load %arg5[%c0_7, %c0_8] : memref<32x128xf32, #tpu.memory_space<vmem>>, vector<32x128xf32>
    tpu.vector_store %arg5[%c0_7, %c0_8], %8 {strides = array<i32>} : memref<32x128xf32, #tpu.memory_space<vmem>>, vector<32x128xf32>,
    return
  }
  func.func @transform_0(%arg0: i32) -> (i32, i32) {
    %c0_i32 = arith.constant 0 : i32
    %c0_i32_0 = arith.constant 0 : i32
    return %arg0, %c0_i32 : i32, i32
  }
  func.func @transform_1(%arg0: i32) -> (i32, i32) {
    %c0_i32 = arith.constant 0 : i32
    %c0_i32_0 = arith.constant 0 : i32
    %c0_i32_1 = arith.constant 0 : i32
    return %c0_i32, %c0_i32_0 : i32, i32
  }
  func.func @transform_2(%arg0: i32) -> (i32, i32) {
    %c0_i32 = arith.constant 0 : i32
    %c0_i32_0 = arith.constant 0 : i32
    %c0_i32_1 = arith.constant 0 : i32
    return %c0_i32, %c0_i32_0 : i32, i32
  }
  func.func @transform_3(%arg0: i32) -> (i32, i32) {
    %c0_i32 = arith.constant 0 : i32
    %c0_i32_0 = arith.constant 0 : i32
    return %arg0, %c0_i32 : i32, i32
  }
  func.func @transform_4(%arg0: i32) -> (i32, i32) {
    %c0_i32 = arith.constant 0 : i32
    %c0_i32_0 = arith.constant 0 : i32
    return %arg0, %c0_i32 : i32, i32
  }
}

module attributes {stable_mosaic.version = 11 : i64} {
  func.func @_head_kernel(%arg0: i32, %arg1: memref<32x128xf32, #tpu.memory_space<vmem>>, %arg2: memref<128x256xbf16, #tpu.memory_space<vmem>>, %arg3: memref<1x256xf32, #tpu.memory_space<vmem>>, %arg4: memref<256x8xbf16, #tpu.memory_space<vmem>>, %arg5: memref<1x8xf32, #tpu.memory_space<vmem>>, %arg6: memref<32x8xf32, #tpu.memory_space<vmem>>) attributes {dimension_semantics = [#tpu.dimension_semantics<parallel>], iteration_bounds = array<i64: 4>, scalar_prefetch = 0 : i64, scratch_operands = 0 : i64, tpu.core_type = #tpu.core_type<tc>, window_params = [{transform_indices = @transform_0, window_bounds = array<i64: 32, 128>}, {pipeline_mode = #tpu.pipeline_mode<synchronous>, transform_indices = @transform_1, window_bounds = array<i64: 128, 256>}, {pipeline_mode = #tpu.pipeline_mode<synchronous>, transform_indices = @transform_2, window_bounds = array<i64: 1, 256>}, {pipeline_mode = #tpu.pipeline_mode<synchronous>, transform_indices = @transform_3, window_bounds = array<i64: 256, 8>}, {pipeline_mode = #tpu.pipeline_mode<synchronous>, transform_indices = @transform_4, window_bounds = array<i64: 1, 8>}, {transform_indices = @transform_5, window_bounds = array<i64: 32, 8>}]} {
    %c0 = arith.constant 0 : index
    %c0_0 = arith.constant 0 : index
    %0 = vector.load %arg1[%c0, %c0_0] : memref<32x128xf32, #tpu.memory_space<vmem>>, vector<32x128xf32>
    %1 = arith.truncf %0 : vector<32x128xf32> to vector<32x128xbf16>
    %c0_1 = arith.constant 0 : index
    %c0_2 = arith.constant 0 : index
    %2 = vector.load %arg2[%c0_1, %c0_2] : memref<128x256xbf16, #tpu.memory_space<vmem>>, vector<128x256xbf16>
    %cst = arith.constant dense<0.000000e+00> : vector<32x256xf32>
    %3 = tpu.matmul %1, %2, %cst {dimension_numbers = #tpu.dot_dimension_numbers<[1], [0], [0], [1], [0, 0, 1, 1], [], []>} : vector<32x128xbf16>, vector<128x256xbf16>, vector<32x256xf32> -> vector<32x256xf32>
    %c0_3 = arith.constant 0 : index
    %c0_4 = arith.constant 0 : index
    %4 = vector.load %arg3[%c0_3, %c0_4] : memref<1x256xf32, #tpu.memory_space<vmem>>, vector<1x256xf32>
    %5 = vector.broadcast %4 : vector<1x256xf32> to vector<32x256xf32>
    %6 = arith.addf %3, %5 : vector<32x256xf32>
    %cst_5 = arith.constant 5.000000e-01 : f32
    %7 = vector.broadcast %cst_5 : f32 to vector<32x256xf32>
    %8 = arith.mulf %7, %6 : vector<32x256xf32>
    %cst_6 = arith.constant 0.707106769 : f32
    %9 = vector.broadcast %cst_6 : f32 to vector<32x256xf32>
    %10 = arith.mulf %6, %9 : vector<32x256xf32>
    %cst_7 = arith.constant 0.000000e+00 : f32
    %11 = vector.broadcast %cst_7 : f32 to vector<32x256xf32>
    %12 = arith.cmpf oge, %10, %11 : vector<32x256xf32>
    %cst_8 = arith.constant 1.000000e+00 : f32
    %cst_9 = arith.constant -1.000000e+00 : f32
    %13 = vector.broadcast %cst_8 : f32 to vector<32x256xf32>
    %14 = vector.broadcast %cst_9 : f32 to vector<32x256xf32>
    %15 = arith.select %12, %13, %14 : vector<32x256xi1>, vector<32x256xf32>
    %16 = math.absf %10 : vector<32x256xf32>
    %cst_10 = arith.constant 0.327591091 : f32
    %17 = vector.broadcast %cst_10 : f32 to vector<32x256xf32>
    %18 = arith.mulf %17, %16 : vector<32x256xf32>
    %cst_11 = arith.constant 1.000000e+00 : f32
    %19 = vector.broadcast %cst_11 : f32 to vector<32x256xf32>
    %20 = arith.addf %19, %18 : vector<32x256xf32>
    %cst_12 = arith.constant 1.000000e+00 : f32
    %21 = vector.broadcast %cst_12 : f32 to vector<32x256xf32>
    %22 = arith.divf %21, %20 : vector<32x256xf32>
    %cst_13 = arith.constant 1.06140542 : f32
    %23 = vector.broadcast %cst_13 : f32 to vector<32x256xf32>
    %24 = arith.mulf %23, %22 : vector<32x256xf32>
    %cst_14 = arith.constant -1.45315206 : f32
    %25 = vector.broadcast %cst_14 : f32 to vector<32x256xf32>
    %26 = arith.addf %24, %25 : vector<32x256xf32>
    %27 = arith.mulf %26, %22 : vector<32x256xf32>
    %cst_15 = arith.constant 1.42141378 : f32
    %28 = vector.broadcast %cst_15 : f32 to vector<32x256xf32>
    %29 = arith.addf %27, %28 : vector<32x256xf32>
    %30 = arith.mulf %29, %22 : vector<32x256xf32>
    %cst_16 = arith.constant -0.284496725 : f32
    %31 = vector.broadcast %cst_16 : f32 to vector<32x256xf32>
    %32 = arith.addf %30, %31 : vector<32x256xf32>
    %33 = arith.mulf %32, %22 : vector<32x256xf32>
    %cst_17 = arith.constant 0.254829586 : f32
    %34 = vector.broadcast %cst_17 : f32 to vector<32x256xf32>
    %35 = arith.addf %33, %34 : vector<32x256xf32>
    %36 = arith.mulf %35, %22 : vector<32x256xf32>
    %cst_18 = arith.constant 0.000000e+00 : f32
    %37 = vector.broadcast %cst_18 : f32 to vector<32x256xf32>
    %38 = arith.subf %37, %16 : vector<32x256xf32>
    %39 = arith.mulf %38, %16 : vector<32x256xf32>
    %40 = math.exp %39 : vector<32x256xf32>
    %41 = arith.mulf %36, %40 : vector<32x256xf32>
    %cst_19 = arith.constant 1.000000e+00 : f32
    %42 = vector.broadcast %cst_19 : f32 to vector<32x256xf32>
    %43 = arith.subf %42, %41 : vector<32x256xf32>
    %44 = arith.mulf %15, %43 : vector<32x256xf32>
    %cst_20 = arith.constant 1.000000e+00 : f32
    %45 = vector.broadcast %cst_20 : f32 to vector<32x256xf32>
    %46 = arith.addf %45, %44 : vector<32x256xf32>
    %47 = arith.mulf %8, %46 : vector<32x256xf32>
    %48 = arith.truncf %47 : vector<32x256xf32> to vector<32x256xbf16>
    %c0_21 = arith.constant 0 : index
    %c0_22 = arith.constant 0 : index
    %49 = vector.load %arg4[%c0_21, %c0_22] : memref<256x8xbf16, #tpu.memory_space<vmem>>, vector<256x8xbf16>
    %cst_23 = arith.constant dense<0.000000e+00> : vector<32x8xf32>
    %50 = tpu.matmul %48, %49, %cst_23 {dimension_numbers = #tpu.dot_dimension_numbers<[1], [0], [0], [1], [0, 0, 1, 1], [], []>} : vector<32x256xbf16>, vector<256x8xbf16>, vector<32x8xf32> -> vector<32x8xf32>
    %c0_24 = arith.constant 0 : index
    %c0_25 = arith.constant 0 : index
    %51 = vector.load %arg5[%c0_24, %c0_25] : memref<1x8xf32, #tpu.memory_space<vmem>>, vector<1x8xf32>
    %52 = vector.broadcast %51 : vector<1x8xf32> to vector<32x8xf32>
    %53 = arith.addf %50, %52 : vector<32x8xf32>
    %c0_26 = arith.constant 0 : index
    %c0_27 = arith.constant 0 : index
    %54 = vector.load %arg6[%c0_26, %c0_27] : memref<32x8xf32, #tpu.memory_space<vmem>>, vector<32x8xf32>
    tpu.vector_store %arg6[%c0_26, %c0_27], %53 {strides = array<i32>} : memref<32x8xf32, #tpu.memory_space<vmem>>, vector<32x8xf32>,
    return
  }
  func.func @transform_0(%arg0: i32) -> (i32, i32) {
    %c0_i32 = arith.constant 0 : i32
    %c0_i32_0 = arith.constant 0 : i32
    return %arg0, %c0_i32 : i32, i32
  }
  func.func @transform_1(%arg0: i32) -> (i32, i32) {
    %c0_i32 = arith.constant 0 : i32
    %c0_i32_0 = arith.constant 0 : i32
    %c0_i32_1 = arith.constant 0 : i32
    return %c0_i32, %c0_i32_0 : i32, i32
  }
  func.func @transform_2(%arg0: i32) -> (i32, i32) {
    %c0_i32 = arith.constant 0 : i32
    %c0_i32_0 = arith.constant 0 : i32
    %c0_i32_1 = arith.constant 0 : i32
    return %c0_i32, %c0_i32_0 : i32, i32
  }
  func.func @transform_3(%arg0: i32) -> (i32, i32) {
    %c0_i32 = arith.constant 0 : i32
    %c0_i32_0 = arith.constant 0 : i32
    %c0_i32_1 = arith.constant 0 : i32
    return %c0_i32, %c0_i32_0 : i32, i32
  }
  func.func @transform_4(%arg0: i32) -> (i32, i32) {
    %c0_i32 = arith.constant 0 : i32
    %c0_i32_0 = arith.constant 0 : i32
    %c0_i32_1 = arith.constant 0 : i32
    return %c0_i32, %c0_i32_0 : i32, i32
  }
  func.func @transform_5(%arg0: i32) -> (i32, i32) {
    %c0_i32 = arith.constant 0 : i32
    %c0_i32_0 = arith.constant 0 : i32
    return %arg0, %c0_i32 : i32, i32
  }
}

</mosaic_0001>

<bundles_post_ra>
// kernel: fno2d_forward.8
= control target key start
LH: loop header
LB: loop body
LE: loop exit
PB: predicated region body
PF: predicated region fallthrough
CT: control target
= control target key end

     0   :  { %s335_s12 = smov 0   ;;  %s358_s0 = inlined_call_operand.vmem [shape: f32[128,16], index: 0, kind: input, shape index: {}]   ;;  %s359_s1 = inlined_call_operand.vmem [shape: bf16[16,128], index: 1, kind: input, shape index: {}]   ;;  %s360_s2 = inlined_call_operand.vmem [shape: f32[1,128], index: 2, kind: input, shape index: {}]   ;;  %s361_s3 = inlined_call_operand.vmem [shape: f32[128,128], index: 3, kind: output, shape index: {}]  }
   0x1 LB: > { %s279_s13 = sadd.s32 4294967295, %s313_s12   ;;  %p283_p0 = scmp.ge.s32.totalorder %s313_s12, 1  ;;  %s313_s12 = sphi %s335_s12, %s13_s12  }
   0x2   : > { %p138_p1 = scmp.lt.s32.totalorder %s313_s12, 5 }
   0x4   : > { %p139_p2 = pnand %p283_p0, %p138_p1 }
   0x5   : > { %s284_s16 = sshll.u32 (!%p139_p2), %s279_s13, 2 }
   0x6   : > { %142 = sbr.rel (%p139_p2) target bundleno = 155 (0x9b), region = 32  ;;  %p163_p3 = scmp.lt.s32.totalorder (!%p139_p2), %s284_s16, 15 }
   0xb   : > { %v296_v0 = vld [vmem:[%s359_s1] sm:$0xff]  ;;  %s363_s16 = smov (!%p163_p3, %s284_s16), 15  ;;  %vm193_vm0 = vcmask 130048  }
   0xc   : > { %207 = vmatpush.bf16.msra.mxu0 %v296_v0  ;;  %297 = vmatpush.bf16.msra.mxu1 %v296_v0  ;;  %s285_s17 = sshll.u32 %s363_s16, 3  ;;  %v306_v7 = vld [vmem:[%s360_s2] ss:$0 sm:$0xff] }
   0xd   : > { %s166_s20 = scalar_lea.vmem %s358_s0, %s285_s17  ;;  %s172_s25 = scalar_lea.vmem %s361_s3, %s285_s17 }
   0xe   : > { %v175_v1 = vld [vmem:[%s166_s20] sm:$0xff]  ;;  %v176_v2 = vld [vmem:[%s166_s20 + $0x8] sm:$0xff]  ;;  %v177_v3 = vld [vmem:[%s166_s20 + $0x10] sm:$0xff] }
   0xf   : > { %v179_v4 = vpack.c.bf16 %v176_v2, %v175_v1  ;;  %v178_v5 = vld [vmem:[%s166_s20 + $0x18] sm:$0xff] }
  0x10   : > { %v180_v6 = vpack.c.bf16 %v178_v5, %v177_v3 }
  0x11   : > { %292 = vmatmul.msk.bf16.vlgmr.msra.gmra.mxu0 %vm193_vm0, %v179_v4 }
  0x12   : > { %293 = vmatmul.msk.bf16.vlgmr.msra.gmra.mxu1 %vm193_vm0, %v180_v6 }
  0x8e   : > { %v209_v8 = vpop.f32.mrf.mxu0 }
  0x8f   : > { %v210_v9 = vadd.f32 %v306_v7, %v209_v8  ;;  %v214_v10 = vpop.f32.mrf.mxu1 }
  0x90   : > { %v215_v11 = vadd.f32 %v306_v7, %v214_v10 }
  0x91   : > { %219 = vst [vmem:[%s172_s25] sm:$0xff] %v210_v9 }
  0x92   : > { %221 = vst [vmem:[%s172_s25 + $0x10] sm:$0xff] %v215_v11 }
  0x96   : > { %v211_v12 = vpop.f32.mrf.mxu0 }
  0x97   : > { %v212_v13 = vadd.f32 %v306_v7, %v211_v12  ;;  %v216_v14 = vpop.f32.mrf.mxu1 }
  0x98   : > { %v217_v15 = vadd.f32 %v306_v7, %v216_v14 }
  0x99   : > { %220 = vst [vmem:[%s172_s25 + $0x8] sm:$0xff] %v212_v13 }
  0x9a   : > { %222 = vst [vmem:[%s172_s25 + $0x18] sm:$0xff] %v217_v15 }
  0x9b PF: > { %s13_s12 = sadd.s32 1, %s313_s12  }
  0x9c   : > { %p10_p4 = scmp.ge.s32.totalorder %s13_s12, 6  }
  0x9e   :  { %12 = sbr.rel (!%p10_p4) target bundleno = 1 (0x1), region = 62 }

// kernel: fno2d_forward.9
= control target key start
LH: loop header
LB: loop body
LE: loop exit
PB: predicated region body
PF: predicated region fallthrough
CT: control target
= control target key end

     0   :  { %s2409_s15 = smov 0   ;;  %s2646_s0 = inlined_call_operand.vmem [shape: f32[32,4,128], index: 0, kind: input, shape index: {}]   ;;  %s2647_s1 = inlined_call_operand.vmem [shape: bf16[32,128,128], index: 1, kind: input, shape index: {}]   ;;  %s2648_s2 = inlined_call_operand.vmem [shape: bf16[32,128,128], index: 2, kind: input, shape index: {}]   ;;  %s2649_s3 = inlined_call_operand.vmem [shape: f32[32,2,128], index: 3, kind: output, shape index: {0}]   ;;  %s2650_s4 = inlined_call_operand.vmem [shape: f32[32,2,128], index: 4, kind: output, shape index: {1}]  }
   0x1 LB: > { %s1707_s16 = sadd.s32 4294967295, %s2382_s15   ;;  %p1711_p0 = scmp.ge.s32.totalorder %s2382_s15, 1  ;;  %s2382_s15 = sphi %s2409_s15, %s15_s15  }
   0x2   : > { %p190_p1 = scmp.lt.s32.totalorder %s2382_s15, 5 }
   0x4   : > { %p191_p2 = pnand %p1711_p0, %p190_p1 }
   0x5   : > { %s1712_s17 = sshll.u32 (!%p191_p2), %s1707_s16, 3 }
   0x6   : > { %194 = sbr.rel (%p191_p2) target bundleno = 285 (0x11d), region = 32  ;;  %p234_p3 = scmp.lt.s32.totalorder (!%p191_p2), %s1712_s17, 31 }
   0xb   : > { %s2652_s17 = smov (!%p234_p3, %s1712_s17), 31 }
   0xc   : > { %s2238_s18 = sshll.u32 %s2652_s17, 6  ;;  %s1713_s22 = sshll.u32 %s2652_s17, 2 }
   0xd   : > { %s2425_s21 = scalar_lea.vmem %s2647_s1, %s2238_s18  ;;  %s2459_s25 = scalar_lea.vmem %s2646_s0, %s1713_s22 }
   0xe   : > { %v2247_v0 = vld [vmem:[%s2425_s21 + $0x38] sm:$0xff]  ;;  %v2246_v4 = vld [vmem:[%s2425_s21 + $0x30] sm:$0xff]  ;;  %v2245_v8 = vld [vmem:[%s2425_s21 + $0x28] sm:$0xff]  ;;  %s2514_s28 = scalar_lea.vmem %s2648_s2, %s2238_s18  ;;  %s1721_s29 = sshll.u32 %s2652_s17, 1 }
   0xf   : > { %v2255_v1 = vld [vmem:[%s2425_s21 + $0x78] sm:$0xff]  ;;  %457 = vmatpush.bf16.msra.mxu0 %v2247_v0  ;;  %v2254_v5 = vld [vmem:[%s2425_s21 + $0x70] sm:$0xff]  ;;  %v2253_v9 = vld [vmem:[%s2425_s21 + $0x68] sm:$0xff]  ;;  %s2616_s6 = scalar_lea.vmem %s2650_s4, %s1721_s29  ;;  %s2621_s9 = scalar_lea.vmem %s2649_s3, %s1721_s29 }
  0x10   : > { %v2263_v2 = vld [vmem:[%s2425_s21 + $0xb8] sm:$0xff]  ;;  %518 = vmatpush.bf16.msra.mxu1 %v2255_v1  ;;  %v2262_v6 = vld [vmem:[%s2425_s21 + $0xb0] sm:$0xff]  ;;  %v2261_v10 = vld [vmem:[%s2425_s21 + $0xa8] sm:$0xff] }
  0x11   : > { %v2271_v3 = vld [vmem:[%s2425_s21 + $0xf8] sm:$0xff]  ;;  %579 = vmatpush.bf16.msra.mxu2 %v2263_v2  ;;  %v2270_v7 = vld [vmem:[%s2425_s21 + $0xf0] sm:$0xff]  ;;  %v2269_v11 = vld [vmem:[%s2425_s21 + $0xe8] sm:$0xff] }
  0x12   : > { %640 = vmatpush.bf16.msra.mxu3 %v2271_v3  ;;  %v2244_v12 = vld [vmem:[%s2425_s21 + $0x20] sm:$0xff]  ;;  %v2243_v16 = vld [vmem:[%s2425_s21 + $0x18] sm:$0xff]  ;;  %v2242_v20 = vld [vmem:[%s2425_s21 + $0x10] sm:$0xff] }
  0x13   : > { %458 = vmatpush.bf16.msra.mxu0 %v2246_v4  ;;  %v2252_v13 = vld [vmem:[%s2425_s21 + $0x60] sm:$0xff]  ;;  %v2251_v17 = vld [vmem:[%s2425_s21 + $0x58] sm:$0xff]  ;;  %v2250_v21 = vld [vmem:[%s2425_s21 + $0x50] sm:$0xff] }
  0x14   : > { %519 = vmatpush.bf16.msra.mxu1 %v2254_v5  ;;  %v2260_v14 = vld [vmem:[%s2425_s21 + $0xa0] sm:$0xff]  ;;  %v2259_v18 = vld [vmem:[%s2425_s21 + $0x98] sm:$0xff]  ;;  %v2258_v22 = vld [vmem:[%s2425_s21 + $0x90] sm:$0xff] }
  0x15   : > { %580 = vmatpush.bf16.msra.mxu2 %v2262_v6  ;;  %v2268_v15 = vld [vmem:[%s2425_s21 + $0xe0] sm:$0xff]  ;;  %v2267_v19 = vld [vmem:[%s2425_s21 + $0xd8] sm:$0xff]  ;;  %v2266_v23 = vld [vmem:[%s2425_s21 + $0xd0] sm:$0xff] }
  0x16   : > { %641 = vmatpush.bf16.msra.mxu3 %v2270_v7  ;;  %v2241_v24 = vld [vmem:[%s2425_s21 + $0x8] sm:$0xff]  ;;  %v2240_v28 = vld [vmem:[%s2425_s21] sm:$0xff]  ;;  %v2279_v32 = vld [vmem:[%s2425_s21 + $0x138] sm:$0xff] }
  0x17   : > { %459 = vmatpush.bf16.msra.mxu0 %v2245_v8  ;;  %v2249_v25 = vld [vmem:[%s2425_s21 + $0x48] sm:$0xff]  ;;  %v2248_v29 = vld [vmem:[%s2425_s21 + $0x40] sm:$0xff]  ;;  %v2287_v35 = vld [vmem:[%s2425_s21 + $0x178] sm:$0xff] }
  0x18   : > { %520 = vmatpush.bf16.msra.mxu1 %v2253_v9  ;;  %v2257_v26 = vld [vmem:[%s2425_s21 + $0x88] sm:$0xff]  ;;  %v2256_v30 = vld [vmem:[%s2425_s21 + $0x80] sm:$0xff]  ;;  %v2295_v38 = vld [vmem:[%s2425_s21 + $0x1b8] sm:$0xff] }
  0x19   : > { %581 = vmatpush.bf16.msra.mxu2 %v2261_v10  ;;  %v2265_v27 = vld [vmem:[%s2425_s21 + $0xc8] sm:$0xff]  ;;  %v2264_v31 = vld [vmem:[%s2425_s21 + $0xc0] sm:$0xff]  ;;  %v2303_v39 = vld [vmem:[%s2425_s21 + $0x1f8] sm:$0xff] }
  0x1a   : > { %642 = vmatpush.bf16.msra.mxu3 %v2269_v11  ;;  %v267_v33 = vld [vmem:[%s2459_s25 + $0x8] sm:$0xf]  ;;  %v268_v34 = vld [vmem:[%s2459_s25 + $0xc] sm:$0xf]  ;;  %v265_v36 = vld [vmem:[%s2459_s25] sm:$0xf] }
  0x1b   : > { %460 = vmatpush.bf16.msra.mxu0 %v2244_v12  ;;  %v266_v37 = vld [vmem:[%s2459_s25 + $0x4] sm:$0xf]  ;;  %v2473_v40 = vpack.c.bf16 %v267_v33, %v267_v33  ;;  %v2475_v41 = vpack.c.bf16 %v268_v34, %v268_v34  ;;  %v2477_v42 = vpack.c.bf16 %v265_v36, %v265_v36  ;;  %v2278_v44 = vld [vmem:[%s2425_s21 + $0x130] sm:$0xff]  ;;  %v2277_v48 = vld [vmem:[%s2425_s21 + $0x128] sm:$0xff] }
  0x1c   : > { %521 = vmatpush.bf16.msra.mxu1 %v2252_v13  ;;  %v2479_v43 = vpack.c.bf16 %v266_v37, %v266_v37  ;;  %v2286_v45 = vld [vmem:[%s2425_s21 + $0x170] sm:$0xff]  ;;  %v2285_v49 = vld [vmem:[%s2425_s21 + $0x168] sm:$0xff]  ;;  %v2276_v52 = vld [vmem:[%s2425_s21 + $0x120] sm:$0xff] }
  0x1d   : > { %582 = vmatpush.bf16.msra.mxu2 %v2260_v14  ;;  %v2294_v46 = vld [vmem:[%s2425_s21 + $0x1b0] sm:$0xff]  ;;  %v2293_v50 = vld [vmem:[%s2425_s21 + $0x1a8] sm:$0xff]  ;;  %v2284_v53 = vld [vmem:[%s2425_s21 + $0x160] sm:$0xff] }
  0x1e   : > { %643 = vmatpush.bf16.msra.mxu3 %v2268_v15  ;;  %v2302_v47 = vld [vmem:[%s2425_s21 + $0x1f0] sm:$0xff]  ;;  %v2301_v51 = vld [vmem:[%s2425_s21 + $0x1e8] sm:$0xff]  ;;  %v2292_v54 = vld [vmem:[%s2425_s21 + $0x1a0] sm:$0xff] }
  0x1f   : > { %461 = vmatpush.bf16.msra.mxu0 %v2243_v16  ;;  %v2300_v55 = vld [vmem:[%s2425_s21 + $0x1e0] sm:$0xff]  ;;  %v2275_v56 = vld [vmem:[%s2425_s21 + $0x118] sm:$0xff]  ;;  %v2274_v60 = vld [vmem:[%s2425_s21 + $0x110] sm:$0xff] }
  0x20   : > { %522 = vmatpush.bf16.msra.mxu1 %v2251_v17  ;;  %v2283_v57 = vld [vmem:[%s2425_s21 + $0x158] sm:$0xff]  ;;  %v2282_v61 = vld [vmem:[%s2425_s21 + $0x150] sm:$0xff]  ;;  %v2273_v0 = vld [vmem:[%s2425_s21 + $0x108] sm:$0xff] }
  0x21   : > { %583 = vmatpush.bf16.msra.mxu2 %v2259_v18  ;;  %v2291_v58 = vld [vmem:[%s2425_s21 + $0x198] sm:$0xff]  ;;  %v2290_v62 = vld [vmem:[%s2425_s21 + $0x190] sm:$0xff]  ;;  %v2281_v1 = vld [vmem:[%s2425_s21 + $0x148] sm:$0xff] }
  0x22   : > { %644 = vmatpush.bf16.msra.mxu3 %v2267_v19  ;;  %v2299_v59 = vld [vmem:[%s2425_s21 + $0x1d8] sm:$0xff]  ;;  %v2298_v63 = vld [vmem:[%s2425_s21 + $0x1d0] sm:$0xff]  ;;  %v2289_v2 = vld [vmem:[%s2425_s21 + $0x188] sm:$0xff] }
  0x23   : > { %462 = vmatpush.bf16.msra.mxu0 %v2242_v20  ;;  %v2297_v3 = vld [vmem:[%s2425_s21 + $0x1c8] sm:$0xff]  ;;  %v2272_v4 = vld [vmem:[%s2425_s21 + $0x100] sm:$0xff]  ;;  %v2311_v8 = vld [vmem:[%s2514_s28 + $0x38] sm:$0xff] }
  0x24   : > { %523 = vmatpush.bf16.msra.mxu1 %v2250_v21  ;;  %v2280_v5 = vld [vmem:[%s2425_s21 + $0x140] sm:$0xff]  ;;  %v269_v9 = vld [vmem:[%s2459_s25 + $0x10] sm:$0xf]  ;;  %v270_v10 = vld [vmem:[%s2459_s25 + $0x14] sm:$0xf] }
  0x25   : > { %584 = vmatpush.bf16.msra.mxu2 %v2258_v22  ;;  %v2288_v6 = vld [vmem:[%s2425_s21 + $0x180] sm:$0xff]  ;;  %v2319_v11 = vld [vmem:[%s2514_s28 + $0x78] sm:$0xff]  ;;  %v2528_v16 = vpack.c.bf16 %v269_v9, %v269_v9  ;;  %v2530_v17 = vpack.c.bf16 %v270_v10, %v270_v10  ;;  %v2310_v20 = vld [vmem:[%s2514_s28 + $0x30] sm:$0xff] }
  0x26   : > { %645 = vmatpush.bf16.msra.mxu3 %v2266_v23  ;;  %v2296_v7 = vld [vmem:[%s2425_s21 + $0x1c0] sm:$0xff]  ;;  %v271_v12 = vld [vmem:[%s2459_s25 + $0x18] sm:$0xf]  ;;  %v272_v13 = vld [vmem:[%s2459_s25 + $0x1c] sm:$0xf] }
  0x27   : > { %463 = vmatpush.bf16.msra.mxu0 %v2241_v24  ;;  %v2327_v14 = vld [vmem:[%s2514_s28 + $0xb8] sm:$0xff]  ;;  %v2532_v18 = vpack.c.bf16 %v271_v12, %v271_v12  ;;  %v2534_v19 = vpack.c.bf16 %v272_v13, %v272_v13  ;;  %v2318_v21 = vld [vmem:[%s2514_s28 + $0x70] sm:$0xff]  ;;  %v2309_v24 = vld [vmem:[%s2514_s28 + $0x28] sm:$0xff] }
  0x28   : > { %524 = vmatpush.bf16.msra.mxu1 %v2249_v25  ;;  %v2335_v15 = vld [vmem:[%s2514_s28 + $0xf8] sm:$0xff]  ;;  %v2326_v22 = vld [vmem:[%s2514_s28 + $0xb0] sm:$0xff]  ;;  %v2317_v25 = vld [vmem:[%s2514_s28 + $0x68] sm:$0xff] }
  0x29   : > { %585 = vmatpush.bf16.msra.mxu2 %v2257_v26  ;;  %v2334_v23 = vld [vmem:[%s2514_s28 + $0xf0] sm:$0xff]  ;;  %v2325_v26 = vld [vmem:[%s2514_s28 + $0xa8] sm:$0xff]  ;;  %v2315_v33 = vld [vmem:[%s2514_s28 + $0x58] sm:$0xff] }
  0x2a   : > { %646 = vmatpush.bf16.msra.mxu3 %v2265_v27  ;;  %v2333_v27 = vld [vmem:[%s2514_s28 + $0xe8] sm:$0xff]  ;;  %v2323_v34 = vld [vmem:[%s2514_s28 + $0x98] sm:$0xff]  ;;  %v2306_v36 = vld [vmem:[%s2514_s28 + $0x10] sm:$0xff] }
  0x2b   : > { %464 = vmatpush.bf16.msra.mxu0 %v2240_v28  ;;  %v2308_v28 = vld [vmem:[%s2514_s28 + $0x20] sm:$0xff]  ;;  %v2314_v37 = vld [vmem:[%s2514_s28 + $0x50] sm:$0xff]  ;;  %v2345_v9 = vld [vmem:[%s2514_s28 + $0x148] sm:$0xff] }
  0x2c   : > { %525 = vmatpush.bf16.msra.mxu1 %v2248_v29  ;;  %v2316_v29 = vld [vmem:[%s2514_s28 + $0x60] sm:$0xff]  ;;  %v2353_v10 = vld [vmem:[%s2514_s28 + $0x188] sm:$0xff] }
  0x2d   : > { %586 = vmatpush.bf16.msra.mxu2 %v2256_v30  ;;  %v2324_v30 = vld [vmem:[%s2514_s28 + $0xa0] sm:$0xff] }
  0x2e   : > { %647 = vmatpush.bf16.msra.mxu3 %v2264_v31  ;;  %465 = vmatmul.bf16.vlgmr.msra.gmra.mxu0 %v2477_v42  ;;  %v2332_v31 = vld [vmem:[%s2514_s28 + $0xe0] sm:$0xff] }
  0x2f   : > { %701 = vmatpush.bf16.msrb.mxu0 %v2279_v32  ;;  %526 = vmatmul.bf16.vlgmr.msra.gmra.mxu1 %v2479_v43  ;;  %v2307_v32 = vld [vmem:[%s2514_s28 + $0x18] sm:$0xff]  ;;  %v2336_v12 = vld [vmem:[%s2514_s28 + $0x100] sm:$0xff] }
  0x30   : > { %762 = vmatpush.bf16.msrb.mxu1 %v2287_v35  ;;  %587 = vmatmul.bf16.vlgmr.msra.gmra.mxu2 %v2473_v40  ;;  %v2331_v35 = vld [vmem:[%s2514_s28 + $0xd8] sm:$0xff]  ;;  %v2344_v13 = vld [vmem:[%s2514_s28 + $0x140] sm:$0xff] }
  0x31   : > { %823 = vmatpush.bf16.msrb.mxu2 %v2295_v38  ;;  %648 = vmatmul.bf16.vlgmr.msra.gmra.mxu3 %v2475_v41  ;;  %v2322_v38 = vld [vmem:[%s2514_s28 + $0x90] sm:$0xff] }
  0x32   : > { %884 = vmatpush.bf16.msrb.mxu3 %v2303_v39  ;;  %v2330_v39 = vld [vmem:[%s2514_s28 + $0xd0] sm:$0xff] }
  0x33   : > { %702 = vmatpush.bf16.msrb.mxu0 %v2278_v44  ;;  %v2305_v44 = vld [vmem:[%s2514_s28 + $0x8] sm:$0xff] }
  0x34   : > { %763 = vmatpush.bf16.msrb.mxu1 %v2286_v45  ;;  %v2313_v45 = vld [vmem:[%s2514_s28 + $0x48] sm:$0xff] }
  0x35   : > { %824 = vmatpush.bf16.msrb.mxu2 %v2294_v46  ;;  %v2321_v46 = vld [vmem:[%s2514_s28 + $0x88] sm:$0xff] }
  0x36   : > { %885 = vmatpush.bf16.msrb.mxu3 %v2302_v47  ;;  %v2329_v47 = vld [vmem:[%s2514_s28 + $0xc8] sm:$0xff] }
  0x37   : > { %703 = vmatpush.bf16.msrb.mxu0 %v2277_v48  ;;  %v2304_v48 = vld [vmem:[%s2514_s28] sm:$0xff] }
  0x38   : > { %764 = vmatpush.bf16.msrb.mxu1 %v2285_v49  ;;  %v2312_v49 = vld [vmem:[%s2514_s28 + $0x40] sm:$0xff] }
  0x39   : > { %825 = vmatpush.bf16.msrb.mxu2 %v2293_v50  ;;  %v2320_v50 = vld [vmem:[%s2514_s28 + $0x80] sm:$0xff] }
  0x3a   : > { %886 = vmatpush.bf16.msrb.mxu3 %v2301_v51  ;;  %v2328_v51 = vld [vmem:[%s2514_s28 + $0xc0] sm:$0xff] }
  0x3b   : > { %704 = vmatpush.bf16.msrb.mxu0 %v2276_v52  ;;  %v2343_v52 = vld [vmem:[%s2514_s28 + $0x138] sm:$0xff] }
  0x3c   : > { %765 = vmatpush.bf16.msrb.mxu1 %v2284_v53  ;;  %v2351_v53 = vld [vmem:[%s2514_s28 + $0x178] sm:$0xff] }
  0x3d   : > { %826 = vmatpush.bf16.msrb.mxu2 %v2292_v54  ;;  %v2359_v54 = vld [vmem:[%s2514_s28 + $0x1b8] sm:$0xff] }
  0x3e   : > { %887 = vmatpush.bf16.msrb.mxu3 %v2300_v55  ;;  %v2367_v55 = vld [vmem:[%s2514_s28 + $0x1f8] sm:$0xff] }
  0x3f   : > { %705 = vmatpush.bf16.msrb.mxu0 %v2275_v56  ;;  %v2342_v56 = vld [vmem:[%s2514_s28 + $0x130] sm:$0xff] }
  0x40   : > { %766 = vmatpush.bf16.msrb.mxu1 %v2283_v57  ;;  %v2350_v57 = vld [vmem:[%s2514_s28 + $0x170] sm:$0xff] }
  0x41   : > { %827 = vmatpush.bf16.msrb.mxu2 %v2291_v58  ;;  %v2358_v58 = vld [vmem:[%s2514_s28 + $0x1b0] sm:$0xff] }
  0x42   : > { %888 = vmatpush.bf16.msrb.mxu3 %v2299_v59  ;;  %v2366_v59 = vld [vmem:[%s2514_s28 + $0x1f0] sm:$0xff] }
  0x43   : > { %706 = vmatpush.bf16.msrb.mxu0 %v2274_v60  ;;  %v2341_v60 = vld [vmem:[%s2514_s28 + $0x128] sm:$0xff] }
  0x44   : > { %767 = vmatpush.bf16.msrb.mxu1 %v2282_v61  ;;  %v2349_v61 = vld [vmem:[%s2514_s28 + $0x168] sm:$0xff] }
  0x45   : > { %828 = vmatpush.bf16.msrb.mxu2 %v2290_v62  ;;  %v2357_v62 = vld [vmem:[%s2514_s28 + $0x1a8] sm:$0xff] }
  0x46   : > { %889 = vmatpush.bf16.msrb.mxu3 %v2298_v63  ;;  %v2365_v63 = vld [vmem:[%s2514_s28 + $0x1e8] sm:$0xff] }
  0x47   : > { %707 = vmatpush.bf16.msrb.mxu0 %v2273_v0  ;;  %v2339_v0 = vld [vmem:[%s2514_s28 + $0x118] sm:$0xff] }
  0x48   : > { %768 = vmatpush.bf16.msrb.mxu1 %v2281_v1  ;;  %v2347_v1 = vld [vmem:[%s2514_s28 + $0x158] sm:$0xff] }
  0x49   : > { %829 = vmatpush.bf16.msrb.mxu2 %v2289_v2  ;;  %v2355_v2 = vld [vmem:[%s2514_s28 + $0x198] sm:$0xff] }
  0x4a   : > { %890 = vmatpush.bf16.msrb.mxu3 %v2297_v3  ;;  %v2363_v3 = vld [vmem:[%s2514_s28 + $0x1d8] sm:$0xff] }
  0x4b   : > { %708 = vmatpush.bf16.msrb.mxu0 %v2272_v4  ;;  %v2338_v4 = vld [vmem:[%s2514_s28 + $0x110] sm:$0xff] }
  0x4c   : > { %769 = vmatpush.bf16.msrb.mxu1 %v2280_v5  ;;  %v2346_v5 = vld [vmem:[%s2514_s28 + $0x150] sm:$0xff] }
  0x4d   : > { %830 = vmatpush.bf16.msrb.mxu2 %v2288_v6  ;;  %v2354_v6 = vld [vmem:[%s2514_s28 + $0x190] sm:$0xff] }
  0x4e   : > { %891 = vmatpush.bf16.msrb.mxu3 %v2296_v7  ;;  %709 = vmatmul.bf16.vlgmr.msrb.gmra.mxu0 %v2528_v16  ;;  %v2362_v7 = vld [vmem:[%s2514_s28 + $0x1d0] sm:$0xff] }
  0x4f   : > { %1073 = vmatpush.bf16.msra.mxu0 %v2311_v8  ;;  %770 = vmatmul.bf16.vlgmr.msrb.gmra.mxu1 %v2530_v17  ;;  %v2337_v8 = vld [vmem:[%s2514_s28 + $0x108] sm:$0xff] }
  0x50   : > { %1134 = vmatpush.bf16.msra.mxu1 %v2319_v11  ;;  %831 = vmatmul.bf16.vlgmr.msrb.gmra.mxu2 %v2532_v18  ;;  %v2361_v11 = vld [vmem:[%s2514_s28 + $0x1c8] sm:$0xff] }
  0x51   : > { %1195 = vmatpush.bf16.msra.mxu2 %v2327_v14  ;;  %892 = vmatmul.bf16.vlgmr.msrb.gmra.mxu3 %v2534_v19  ;;  %v2352_v14 = vld [vmem:[%s2514_s28 + $0x180] sm:$0xff] }
  0x52   : > { %1256 = vmatpush.bf16.msra.mxu3 %v2335_v15  ;;  %v2360_v15 = vld [vmem:[%s2514_s28 + $0x1c0] sm:$0xff] }
  0x53   : > { %1074 = vmatpush.bf16.msra.mxu0 %v2310_v20 }
  0x54   : > { %1135 = vmatpush.bf16.msra.mxu1 %v2318_v21 }
  0x55   : > { %1196 = vmatpush.bf16.msra.mxu2 %v2326_v22 }
  0x56   : > { %1257 = vmatpush.bf16.msra.mxu3 %v2334_v23 }
  0x57   : > { %1075 = vmatpush.bf16.msra.mxu0 %v2309_v24 }
  0x58   : > { %1136 = vmatpush.bf16.msra.mxu1 %v2317_v25 }
  0x59   : > { %1197 = vmatpush.bf16.msra.mxu2 %v2325_v26 }
  0x5a   : > { %1258 = vmatpush.bf16.msra.mxu3 %v2333_v27 }
  0x5b   : > { %1076 = vmatpush.bf16.msra.mxu0 %v2308_v28 }
  0x5c   : > { %1137 = vmatpush.bf16.msra.mxu1 %v2316_v29 }
  0x5d   : > { %1198 = vmatpush.bf16.msra.mxu2 %v2324_v30 }
  0x5e   : > { %1259 = vmatpush.bf16.msra.mxu3 %v2332_v31 }
  0x5f   : > { %1077 = vmatpush.bf16.msra.mxu0 %v2307_v32 }
  0x60   : > { %1138 = vmatpush.bf16.msra.mxu1 %v2315_v33 }
  0x61   : > { %1199 = vmatpush.bf16.msra.mxu2 %v2323_v34 }
  0x62   : > { %1260 = vmatpush.bf16.msra.mxu3 %v2331_v35 }
  0x63   : > { %1078 = vmatpush.bf16.msra.mxu0 %v2306_v36 }
  0x64   : > { %1139 = vmatpush.bf16.msra.mxu1 %v2314_v37 }
  0x65   : > { %1200 = vmatpush.bf16.msra.mxu2 %v2322_v38 }
  0x66   : > { %1261 = vmatpush.bf16.msra.mxu3 %v2330_v39 }
  0x67   : > { %1079 = vmatpush.bf16.msra.mxu0 %v2305_v44 }
  0x68   : > { %1140 = vmatpush.bf16.msra.mxu1 %v2313_v45 }
  0x69   : > { %1201 = vmatpush.bf16.msra.mxu2 %v2321_v46 }
  0x6a   : > { %1262 = vmatpush.bf16.msra.mxu3 %v2329_v47 }
  0x6b   : > { %1080 = vmatpush.bf16.msra.mxu0 %v2304_v48 }
  0x6c   : > { %1141 = vmatpush.bf16.msra.mxu1 %v2312_v49 }
  0x6d   : > { %1202 = vmatpush.bf16.msra.mxu2 %v2320_v50 }
  0x6e   : > { %1263 = vmatpush.bf16.msra.mxu3 %v2328_v51  ;;  %1081 = vmatmul.bf16.vlgmr.msra.gmra.mxu0 %v2477_v42  ;;  %v2340_v42 = vld [vmem:[%s2514_s28 + $0x120] sm:$0xff] }
  0x6f   : > { %1317 = vmatpush.bf16.msrb.mxu0 %v2343_v52  ;;  %1142 = vmatmul.bf16.vlgmr.msra.gmra.mxu1 %v2479_v43  ;;  %v2364_v43 = vld [vmem:[%s2514_s28 + $0x1e0] sm:$0xff] }
  0x70   : > { %1378 = vmatpush.bf16.msrb.mxu1 %v2351_v53  ;;  %1203 = vmatmul.bf16.vlgmr.msra.gmra.mxu2 %v2473_v40  ;;  %v2348_v40 = vld [vmem:[%s2514_s28 + $0x160] sm:$0xff] }
  0x71   : > { %1439 = vmatpush.bf16.msrb.mxu2 %v2359_v54  ;;  %1264 = vmatmul.bf16.vlgmr.msra.gmra.mxu3 %v2475_v41  ;;  %v2356_v41 = vld [vmem:[%s2514_s28 + $0x1a0] sm:$0xff] }
  0x72   : > { %1500 = vmatpush.bf16.msrb.mxu3 %v2367_v55 }
  0x73   : > { %1318 = vmatpush.bf16.msrb.mxu0 %v2342_v56 }
  0x74   : > { %1379 = vmatpush.bf16.msrb.mxu1 %v2350_v57 }
  0x75   : > { %1440 = vmatpush.bf16.msrb.mxu2 %v2358_v58 }
  0x76   : > { %1501 = vmatpush.bf16.msrb.mxu3 %v2366_v59 }
  0x77   : > { %1319 = vmatpush.bf16.msrb.mxu0 %v2341_v60 }
  0x78   : > { %1380 = vmatpush.bf16.msrb.mxu1 %v2349_v61 }
  0x79   : > { %1441 = vmatpush.bf16.msrb.mxu2 %v2357_v62 }
  0x7a   : > { %1502 = vmatpush.bf16.msrb.mxu3 %v2365_v63 }
  0x7b   : > { %1320 = vmatpush.bf16.msrb.mxu0 %v2340_v42 }
  0x7c   : > { %1381 = vmatpush.bf16.msrb.mxu1 %v2348_v40 }
  0x7d   : > { %1442 = vmatpush.bf16.msrb.mxu2 %v2356_v41 }
  0x7e   : > { %1503 = vmatpush.bf16.msrb.mxu3 %v2364_v43 }
  0x7f   : > { %1321 = vmatpush.bf16.msrb.mxu0 %v2339_v0 }
  0x80   : > { %1382 = vmatpush.bf16.msrb.mxu1 %v2347_v1 }
  0x81   : > { %1443 = vmatpush.bf16.msrb.mxu2 %v2355_v2 }
  0x82   : > { %1504 = vmatpush.bf16.msrb.mxu3 %v2363_v3 }
  0x83   : > { %1322 = vmatpush.bf16.msrb.mxu0 %v2338_v4 }
  0x84   : > { %1383 = vmatpush.bf16.msrb.mxu1 %v2346_v5 }
  0x85   : > { %1444 = vmatpush.bf16.msrb.mxu2 %v2354_v6 }
  0x86   : > { %1505 = vmatpush.bf16.msrb.mxu3 %v2362_v7 }
  0x87   : > { %1323 = vmatpush.bf16.msrb.mxu0 %v2337_v8 }
  0x88   : > { %1384 = vmatpush.bf16.msrb.mxu1 %v2345_v9 }
  0x89   : > { %1445 = vmatpush.bf16.msrb.mxu2 %v2353_v10 }
  0x8a   : > { %1506 = vmatpush.bf16.msrb.mxu3 %v2361_v11 }
  0x8b   : > { %1324 = vmatpush.bf16.msrb.mxu0 %v2336_v12 }
  0x8c   : > { %1385 = vmatpush.bf16.msrb.mxu1 %v2344_v13 }
  0x8d   : > { %1446 = vmatpush.bf16.msrb.mxu2 %v2352_v14 }
  0x8e   : > { %1507 = vmatpush.bf16.msrb.mxu3 %v2360_v15  ;;  %1325 = vmatmul.bf16.vlgmr.msrb.gmra.mxu0 %v2528_v16 }
  0x8f   : > { %1386 = vmatmul.bf16.vlgmr.msrb.gmra.mxu1 %v2530_v17 }
  0x90   : > { %1447 = vmatmul.bf16.vlgmr.msrb.gmra.mxu2 %v2532_v18 }
  0x91   : > { %1508 = vmatmul.bf16.vlgmr.msrb.gmra.mxu3 %v2534_v19 }
  0xab   : > { %v466_v20 = vpop.f32.mrf.mxu0 }
  0xac   : > { %v527_v21 = vpop.f32.mrf.mxu1  ;;  %v1561_v19 = vrot.slane %v466_v20, 2 }
  0xad   : > { %v1562_v33 = vrot.slane %v527_v21, 2 }
  0xb3   : > { %v588_v22 = vpop.f32.mrf.mxu2  ;;  %v468_v24 = vpop.f32.mrf.mxu0 }
  0xb4   : > { %v649_v23 = vpop.f32.mrf.mxu3  ;;  %v529_v25 = vpop.f32.mrf.mxu1  ;;  %v1563_v46 = vrot.slane %v588_v22, 2 }
  0xb5   : > { %v1564_v47 = vrot.slane %v649_v23, 2 }
  0xbb   : > { %v590_v26 = vpop.f32.mrf.mxu2 }
  0xbc   : > { %v651_v27 = vpop.f32.mrf.mxu3 }
  0xcb   : > { %v710_v28 = vpop.f32.mrf.mxu0 }
  0xcc   : > { %v771_v29 = vpop.f32.mrf.mxu1  ;;  %v1565_v60 = vrot.slane %v710_v28, 2 }
  0xcd   : > { %v1566_v61 = vrot.slane %v771_v29, 2 }
  0xd3   : > { %v2608_v30 = vpop.f32.mrf.mxu2  ;;  %v712_v17 = vpop.f32.mrf.mxu0 }
  0xd4   : > { %v2610_v16 = vpop.f32.mrf.mxu3  ;;  %v773_v31 = vpop.f32.mrf.mxu1  ;;  %v1567_v2 = vrot.slane %v2608_v30, 2 }
  0xd5   : > { %v1568_v3 = vrot.slane %v2610_v16, 2 }
  0xdb   : > { %v834_v18 = vpop.f32.mrf.mxu2 }
  0xdc   : > { %v895_v32 = vpop.f32.mrf.mxu3 }
  0xeb   : > { %v1082_v34 = vpop.f32.mrf.mxu0 }
  0xec   : > { %v1143_v35 = vpop.f32.mrf.mxu1  ;;  %v1521_v36 = vrot.slane %v1082_v34, 2  ;;  %v1577_v37 = vadd.f32 %v1561_v19, %v1082_v34 }
  0xed   : > { %v1522_v38 = vrot.slane %v1143_v35, 2  ;;  %v1578_v39 = vadd.f32 %v1562_v33, %v1143_v35 }
  0xee   : > { %v1537_v44 = vsub.f32 %v466_v20, %v1521_v36  ;;  %1585 = vst [vmem:[%s2616_s6] sm:$0x3] %v1577_v37 }
  0xef   : > { %v1538_v45 = vsub.f32 %v527_v21, %v1522_v38  ;;  %1586 = vst [vmem:[%s2616_s6 + $0x2] sm:$0x3] %v1578_v39 }
  0xf0   : > { %1545 = vst [vmem:[%s2621_s9] sm:$0x3] %v1537_v44 }
  0xf1   : > { %1546 = vst [vmem:[%s2621_s9 + $0x2] sm:$0x3] %v1538_v45 }
  0xf3   : > { %v1204_v48 = vpop.f32.mrf.mxu2  ;;  %v1084_v54 = vpop.f32.mrf.mxu0 }
  0xf4   : > { %v1265_v49 = vpop.f32.mrf.mxu3  ;;  %v1523_v50 = vrot.slane %v1204_v48, 2  ;;  %v1579_v51 = vadd.f32 %v1563_v46, %v1204_v48  ;;  %v1145_v55 = vpop.f32.mrf.mxu1 }
  0xf5   : > { %v1524_v52 = vrot.slane %v1265_v49, 2  ;;  %v1580_v53 = vadd.f32 %v1564_v47, %v1265_v49 }
  0xf6   : > { %v1539_v56 = vsub.f32 %v588_v22, %v1523_v50  ;;  %1587 = vst [vmem:[%s2616_s6 + $0x4] sm:$0x3] %v1579_v51 }
  0xf7   : > { %v1540_v57 = vsub.f32 %v649_v23, %v1524_v52  ;;  %1588 = vst [vmem:[%s2616_s6 + $0x6] sm:$0x3] %v1580_v53 }
  0xf8   : > { %1547 = vst [vmem:[%s2621_s9 + $0x4] sm:$0x3] %v1539_v56 }
  0xf9   : > { %1548 = vst [vmem:[%s2621_s9 + $0x6] sm:$0x3] %v1540_v57 }
  0xfb   : > { %v1206_v58 = vpop.f32.mrf.mxu2 }
  0xfc   : > { %v1267_v59 = vpop.f32.mrf.mxu3 }
 0x10b   : > { %v1326_v62 = vpop.f32.mrf.mxu0 }
 0x10c   : > { %v1387_v63 = vpop.f32.mrf.mxu1  ;;  %v1525_v42 = vrot.slane %v1326_v62, 2  ;;  %v1581_v40 = vadd.f32 %v1565_v60, %v1326_v62 }
 0x10d   : > { %v1526_v41 = vrot.slane %v1387_v63, 2  ;;  %v1582_v43 = vadd.f32 %v1566_v61, %v1387_v63 }
 0x10e   : > { %v1541_v0 = vsub.f32 %v710_v28, %v1525_v42  ;;  %1589 = vst [vmem:[%s2616_s6 + $0x8] sm:$0x3] %v1581_v40 }
 0x10f   : > { %v1542_v1 = vsub.f32 %v771_v29, %v1526_v41  ;;  %1590 = vst [vmem:[%s2616_s6 + $0xa] sm:$0x3] %v1582_v43 }
 0x110   : > { %1549 = vst [vmem:[%s2621_s9 + $0x8] sm:$0x3] %v1541_v0 }
 0x111   : > { %1550 = vst [vmem:[%s2621_s9 + $0xa] sm:$0x3] %v1542_v1 }
 0x113   : > { %v1448_v4 = vpop.f32.mrf.mxu2  ;;  %v1328_v10 = vpop.f32.mrf.mxu0 }
 0x114   : > { %v1509_v5 = vpop.f32.mrf.mxu3  ;;  %v1527_v6 = vrot.slane %v1448_v4, 2  ;;  %v1583_v7 = vadd.f32 %v1567_v2, %v1448_v4  ;;  %v1389_v11 = vpop.f32.mrf.mxu1 }
 0x115   : > { %v1528_v8 = vrot.slane %v1509_v5, 2  ;;  %v1584_v9 = vadd.f32 %v1568_v3, %v1509_v5 }
 0x116   : > { %v1543_v12 = vsub.f32 %v2608_v30, %v1527_v6  ;;  %1591 = vst [vmem:[%s2616_s6 + $0xc] sm:$0x3] %v1583_v7 }
 0x117   : > { %v1544_v13 = vsub.f32 %v2610_v16, %v1528_v8  ;;  %1592 = vst [vmem:[%s2616_s6 + $0xe] sm:$0x3] %v1584_v9 }
 0x118   : > { %1551 = vst [vmem:[%s2621_s9 + $0xc] sm:$0x3] %v1543_v12 }
 0x119   : > { %1552 = vst [vmem:[%s2621_s9 + $0xe] sm:$0x3] %v1544_v13 }
 0x11b   : > { %v1450_v14 = vpop.f32.mrf.mxu2 }
 0x11c   : > { %v1511_v15 = vpop.f32.mrf.mxu3 }
 0x11d PF: > { %s15_s15 = sadd.s32 1, %s2382_s15  }
 0x11e   : > { %p12_p4 = scmp.ge.s32.totalorder %s15_s15, 6  }
 0x120   :  { %14 = sbr.rel (!%p12_p4) target bundleno = 1 (0x1), region = 80 }

// kernel: reverse.6
= control target key start
LH: loop header
LB: loop body
LE: loop exit
PB: predicated region body
PF: predicated region fallthrough
CT: control target
= control target key end

     0   :  { %s344_s0 = inlined_call_operand.vmem [shape: f32[2,32,16,7], index: 0, kind: input, shape index: {}]   ;;  %s345_s1 = inlined_call_operand.vmem [shape: f32[2,32,16,7], index: 1, kind: output, shape index: {}]  }
   0x1   :  { %v112_v0 = vld [vmem:[%s344_s0 + $0x60] sm:$0xff]  ;;  %v113_v1 = vld [vmem:[%s344_s0 + $0xd0] sm:$0xff]  ;;  %v138_v14 = vld [vmem:[%s344_s0 + $0x68] sm:$0xff] }
   0x2   :  { %v115_v2 = vld [vmem:[%s344_s0 + $0x50] sm:$0xff]  ;;  %4 = vst [vmem:[%s345_s1] sm:$0xff] %v112_v0  ;;  %v117_v3 = vld [vmem:[%s344_s0 + $0xc0] sm:$0xff]  ;;  %v140_v15 = vld [vmem:[%s344_s0 + $0xd8] sm:$0xff] }
   0x3   :  { %114 = vst [vmem:[%s345_s1 + $0x70] sm:$0xff] %v113_v1  ;;  %v119_v4 = vld [vmem:[%s344_s0 + $0x40] sm:$0xff]  ;;  %v121_v5 = vld [vmem:[%s344_s0 + $0xb0] sm:$0xff]  ;;  %v142_v16 = vld [vmem:[%s344_s0 + $0x58] sm:$0xff] }
   0x4   :  { %116 = vst [vmem:[%s345_s1 + $0x10] sm:$0xff] %v115_v2  ;;  %v123_v6 = vld [vmem:[%s344_s0 + $0x30] sm:$0xff]  ;;  %v125_v7 = vld [vmem:[%s344_s0 + $0xa0] sm:$0xff]  ;;  %v144_v17 = vld [vmem:[%s344_s0 + $0xc8] sm:$0xff] }
   0x5   :  { %118 = vst [vmem:[%s345_s1 + $0x80] sm:$0xff] %v117_v3  ;;  %v127_v8 = vld [vmem:[%s344_s0 + $0x20] sm:$0xff]  ;;  %v129_v9 = vld [vmem:[%s344_s0 + $0x90] sm:$0xff]  ;;  %v146_v18 = vld [vmem:[%s344_s0 + $0x48] sm:$0xff] }
   0x6   :  { %120 = vst [vmem:[%s345_s1 + $0x20] sm:$0xff] %v119_v4  ;;  %v131_v10 = vld [vmem:[%s344_s0 + $0x10] sm:$0xff]  ;;  %v133_v11 = vld [vmem:[%s344_s0 + $0x80] sm:$0xff]  ;;  %v148_v19 = vld [vmem:[%s344_s0 + $0xb8] sm:$0xff] }
   0x7   :  { %122 = vst [vmem:[%s345_s1 + $0x90] sm:$0xff] %v121_v5  ;;  %v49_v12 = vld [vmem:[%s344_s0] sm:$0xff]  ;;  %v136_v13 = vld [vmem:[%s344_s0 + $0x70] sm:$0xff]  ;;  %v150_v20 = vld [vmem:[%s344_s0 + $0x38] sm:$0xff] }
   0x8   :  { %124 = vst [vmem:[%s345_s1 + $0x30] sm:$0xff] %v123_v6  ;;  %v152_v21 = vld [vmem:[%s344_s0 + $0xa8] sm:$0xff]  ;;  %v156_v23 = vld [vmem:[%s344_s0 + $0x98] sm:$0xff] }
   0x9   :  { %126 = vst [vmem:[%s345_s1 + $0xa0] sm:$0xff] %v125_v7  ;;  %v154_v22 = vld [vmem:[%s344_s0 + $0x28] sm:$0xff]  ;;  %v158_v24 = vld [vmem:[%s344_s0 + $0x18] sm:$0xff] }
   0xa   :  { %128 = vst [vmem:[%s345_s1 + $0x40] sm:$0xff] %v127_v8  ;;  %v160_v25 = vld [vmem:[%s344_s0 + $0x88] sm:$0xff]  ;;  %v164_v27 = vld [vmem:[%s344_s0 + $0x78] sm:$0xff] }
   0xb   :  { %130 = vst [vmem:[%s345_s1 + $0xb0] sm:$0xff] %v129_v9  ;;  %v162_v26 = vld [vmem:[%s344_s0 + $0x8] sm:$0xff] }
   0xc   :  { %132 = vst [vmem:[%s345_s1 + $0x50] sm:$0xff] %v131_v10 }
   0xd   :  { %134 = vst [vmem:[%s345_s1 + $0xc0] sm:$0xff] %v133_v11 }
   0xe   :  { %135 = vst [vmem:[%s345_s1 + $0x60] sm:$0xff] %v49_v12 }
   0xf   :  { %137 = vst [vmem:[%s345_s1 + $0xd0] sm:$0xff] %v136_v13 }
  0x10   :  { %139 = vst [vmem:[%s345_s1 + $0x8] sm:$0xff] %v138_v14 }
  0x11   :  { %141 = vst [vmem:[%s345_s1 + $0x78] sm:$0xff] %v140_v15 }
  0x12   :  { %143 = vst [vmem:[%s345_s1 + $0x18] sm:$0xff] %v142_v16 }
  0x13   :  { %145 = vst [vmem:[%s345_s1 + $0x88] sm:$0xff] %v144_v17 }
  0x14   :  { %147 = vst [vmem:[%s345_s1 + $0x28] sm:$0xff] %v146_v18 }
  0x15   :  { %149 = vst [vmem:[%s345_s1 + $0x98] sm:$0xff] %v148_v19 }
  0x16   :  { %151 = vst [vmem:[%s345_s1 + $0x38] sm:$0xff] %v150_v20 }
  0x17   :  { %153 = vst [vmem:[%s345_s1 + $0xa8] sm:$0xff] %v152_v21 }
  0x18   :  { %155 = vst [vmem:[%s345_s1 + $0x48] sm:$0xff] %v154_v22 }
  0x19   :  { %157 = vst [vmem:[%s345_s1 + $0xb8] sm:$0xff] %v156_v23 }
  0x1a   :  { %159 = vst [vmem:[%s345_s1 + $0x58] sm:$0xff] %v158_v24 }
  0x1b   :  { %161 = vst [vmem:[%s345_s1 + $0xc8] sm:$0xff] %v160_v25 }
  0x1c   :  { %163 = vst [vmem:[%s345_s1 + $0x68] sm:$0xff] %v162_v26 }
  0x1d   :  { %165 = vst [vmem:[%s345_s1 + $0xd8] sm:$0xff] %v164_v27 }

// kernel: fno2d_forward.10
= control target key start
LH: loop header
LB: loop body
LE: loop exit
PB: predicated region body
PF: predicated region fallthrough
CT: control target
= control target key end

     0   :  { %s677_s15 = smov 0   ;;  %s786_s0 = inlined_call_operand.vmem [shape: f32[128,128], index: 0, kind: input, shape index: {}]   ;;  %s787_s1 = inlined_call_operand.vmem [shape: bf16[128,128], index: 1, kind: input, shape index: {}]   ;;  %s788_s2 = inlined_call_operand.vmem [shape: f32[1,128], index: 2, kind: input, shape index: {}]   ;;  %s789_s3 = inlined_call_operand.vmem [shape: f32[128,128], index: 3, kind: input, shape index: {}]   ;;  %s790_s4 = inlined_call_operand.vmem [shape: f32[128,128], index: 4, kind: output, shape index: {}]  }
   0x1 LB: > { %s556_s16 = sadd.s32 4294967295, %s649_s15   ;;  %p560_p0 = scmp.ge.s32.totalorder %s649_s15, 1  ;;  %s649_s15 = sphi %s677_s15, %s14_s15  }
   0x2   : > { %p174_p1 = scmp.lt.s32.totalorder %s649_s15, 5 }
   0x4   : > { %p175_p2 = pnand %p560_p0, %p174_p1 }
   0x5   : > { %s561_s23 = sshll.u32 (!%p175_p2), %s556_s16, 2 }
   0x6   : > { %178 = sbr.rel (%p175_p2) target bundleno = 236 (0xec), region = 36  ;;  %p206_p3 = scmp.lt.s32.totalorder (!%p175_p2), %s561_s23, 15 }
   0xb   : > { %v608_v0 = vld [vmem:[%s787_s1 + $0x38] sm:$0xff]  ;;  %v607_v1 = vld [vmem:[%s787_s1 + $0x30] sm:$0xff]  ;;  %v606_v2 = vld [vmem:[%s787_s1 + $0x28] sm:$0xff]  ;;  %s792_s23 = smov (!%p206_p3, %s561_s23), 15 }
   0xc   : > { %297 = vmatpush.bf16.msra.mxu0 %v608_v0  ;;  %609 = vmatpush.bf16.msra.mxu1 %v608_v0  ;;  %v605_v3 = vld [vmem:[%s787_s1 + $0x20] sm:$0xff]  ;;  %v604_v4 = vld [vmem:[%s787_s1 + $0x18] sm:$0xff]  ;;  %v603_v5 = vld [vmem:[%s787_s1 + $0x10] sm:$0xff]  ;;  %s703_s30 = sshll.u32 %s792_s23, 3 }
   0xd   : > { %v602_v6 = vld [vmem:[%s787_s1 + $0x8] sm:$0xff]  ;;  %s209_s9 = scalar_lea.vmem %s786_s0, %s703_s30  ;;  %v601_v7 = vld [vmem:[%s787_s1] sm:$0xff]  ;;  %s215_s14 = scalar_lea.vmem %s789_s3, %s703_s30 }
   0xe   : > { %v223_v8 = vld [vmem:[%s209_s9] sm:$0xff]  ;;  %v224_v9 = vld [vmem:[%s209_s9 + $0x8] sm:$0xff]  ;;  %v225_v10 = vld [vmem:[%s209_s9 + $0x10] sm:$0xff]  ;;  %s221_s20 = scalar_lea.vmem %s790_s4, %s703_s30 }
   0xf   : > { %v226_v11 = vld [vmem:[%s209_s9 + $0x18] sm:$0xff]  ;;  %v227_v12 = vpack.c.bf16 %v224_v9, %v223_v8  ;;  %v626_v14 = vld [vmem:[%s788_s2] ss:$0 sm:$0xff]  ;;  %v318_v18 = vld [vmem:[%s215_s14 + $0x10] sm:$0xff] }
  0x10   : > { %298 = vmatpush.bf16.msra.mxu0 %v607_v1  ;;  %610 = vmatpush.bf16.msra.mxu1 %v607_v1  ;;  %v228_v13 = vpack.c.bf16 %v226_v11, %v225_v10  ;;  %v316_v16 = vld [vmem:[%s215_s14] sm:$0xff]  ;;  %v317_v31 = vld [vmem:[%s215_s14 + $0x8] sm:$0xff]  ;;  %v319_v34 = vld [vmem:[%s215_s14 + $0x18] sm:$0xff] }
  0x14   : > { %299 = vmatpush.bf16.msra.mxu0 %v606_v2  ;;  %611 = vmatpush.bf16.msra.mxu1 %v606_v2 }
  0x18   : > { %300 = vmatpush.bf16.msra.mxu0 %v605_v3  ;;  %612 = vmatpush.bf16.msra.mxu1 %v605_v3 }
  0x1c   : > { %301 = vmatpush.bf16.msra.mxu0 %v604_v4  ;;  %613 = vmatpush.bf16.msra.mxu1 %v604_v4 }
  0x20   : > { %302 = vmatpush.bf16.msra.mxu0 %v603_v5  ;;  %614 = vmatpush.bf16.msra.mxu1 %v603_v5 }
  0x24   : > { %303 = vmatpush.bf16.msra.mxu0 %v602_v6  ;;  %615 = vmatpush.bf16.msra.mxu1 %v602_v6 }
  0x28   : > { %304 = vmatpush.bf16.msra.mxu0 %v601_v7  ;;  %616 = vmatpush.bf16.msra.mxu1 %v601_v7 }
  0x2b   : > { %305 = vmatmul.bf16.vlgmr.msra.gmra.mxu0 %v227_v12  ;;  %310 = vmatmul.bf16.vlgmr.msra.gmra.mxu1 %v228_v13 }
  0xa8   : > { %v306_v15 = vpop.f32.mrf.mxu0  ;;  %v311_v17 = vpop.f32.mrf.mxu1 }
  0xa9   : > { %v307_v19 = vadd.f32 %v626_v14, %v306_v15  ;;  %v312_v20 = vadd.f32 %v626_v14, %v311_v17 }
  0xab   : > { %v722_v21 = vadd.f32 %v316_v16, %v307_v19  ;;  %v724_v22 = vadd.f32 %v318_v18, %v312_v20 }
  0xad   : > { %v727_v23 = vmul.f32 0.70710677, %v722_v21  ;;  %v730_v24 = vmul.f32 0.70710677, %v724_v22 }
  0xaf   : > { %v340_v25 = vand.u32 2147483647, %v727_v23  ;;  %v342_v26 = vand.u32 2147483647, %v730_v24 }
  0xb0   : > { %v308_v27 = vpop.f32.mrf.mxu0  ;;  %v313_v28 = vpop.f32.mrf.mxu1 }
  0xb1   : > { %v344_v29 = vmul.f32 0.3275911, %v340_v25  ;;  %v346_v30 = vmul.f32 0.3275911, %v342_v26  ;;  %v309_v32 = vadd.f32 %v626_v14, %v308_v27  ;;  %v314_v33 = vadd.f32 %v626_v14, %v313_v28 }
  0xb2   : > { %v448_v41 = vsub.f32 0.0, %v340_v25  ;;  %v450_v52 = vsub.f32 0.0, %v342_v26 }
  0xb3   : > { %v348_v35 = vadd.f32 1.0, %v344_v29  ;;  %v350_v36 = vadd.f32 1.0, %v346_v30  ;;  %v734_v37 = vadd.f32 %v317_v31, %v309_v32  ;;  %v736_v38 = vadd.f32 %v319_v34, %v314_v33 }
  0xb4   : > { %v452_v51 = vmul.f32 %v448_v41, %v340_v25  ;;  %v454_v3 = vmul.f32 %v450_v52, %v342_v26 }
  0xb5   : > { %627 = vrcp.f32 %v348_v35  ;;  %v739_v39 = vmul.f32 0.70710677, %v734_v37  ;;  %v742_v40 = vmul.f32 0.70710677, %v736_v38  ;;  %v361_v54 = vand.u32 2147483647, %v348_v35 }
  0xb6   : > { %629 = vrcp.f32 %v350_v36  ;;  %v363_v55 = vand.u32 2147483648, %v348_v35  ;;  %v393_v59 = vand.u32 2147483648, %v350_v36  ;;  %v391_v61 = vand.u32 2147483647, %v350_v36 }
  0xb7   : > { %v745_v42 = vand.u32 2147483647, %v739_v39  ;;  %v748_v44 = vand.u32 2147483647, %v742_v40  ;;  %vm357_vm2 = vweird.f32 %v348_v35  ;;  %vm387_vm4 = vweird.f32 %v350_v36 }
  0xb8   : > { %v364_v63 = vor.u32 1.1754944e-38, %v363_v55  ;;  %vm362_vm5 = vcmp.eq.f32.partialorder %v361_v54, 8.507059e+37  ;;  %v394_v2 = vor.u32 1.1754944e-38, %v393_v59  ;;  %v456_v5 = vmul.f32 1.442695, %v452_v51 }
  0xb9   : > { %v345_v47 = vmul.f32 0.3275911, %v745_v42  ;;  %v347_v49 = vmul.f32 0.3275911, %v748_v44  ;;  %vm392_vm7 = vcmp.eq.f32.partialorder %v391_v61, 8.507059e+37  ;;  %v449_v34 = vsub.f32 0.0, %v745_v42 }
  0xba   : > { %v460_v16 = vmul.f32 1.442695, %v454_v3  ;;  %v451_v54 = vsub.f32 0.0, %v748_v44 }
  0xbb   : > { %v628_v43 = vpop.eup %627  ;;  %v752_v53 = vadd.f32 1.0, %v345_v47  ;;  %v754_v57 = vadd.f32 1.0, %v347_v49 }
  0xbc   : > { %v630_v45 = vpop.eup %629  ;;  %v353_v46 = vmul.f32 %v628_v43, %v348_v35  ;;  %vm358_vm0 = vweird.f32 %v628_v43 }
  0xbd   : > { %v383_v48 = vmul.f32 %v630_v45, %v350_v36  ;;  %631 = vrcp.f32 %v752_v53  ;;  %vm388_vm1 = vweird.f32 %v630_v45  ;;  %vm359_vm3 = vmor %vm357_vm2, %vm358_vm0  ;;  %v376_v19 = vand.u32 2147483647, %v752_v53 }
  0xbe   : > { %v354_v50 = vsub.f32 1.0, %v353_v46  ;;  %633 = vrcp.f32 %v754_v57  ;;  %vm389_vm6 = vmor %vm387_vm4, %vm388_vm1  ;;  %v378_v20 = vand.u32 2147483648, %v752_v53  ;;  %v408_v28 = vand.u32 2147483648, %v754_v57 }
  0xbf   : > { %v384_v56 = vsub.f32 1.0, %v383_v48  ;;  %635 = vpow2.f32 %v456_v5  ;;  %v406_v31 = vand.u32 2147483647, %v754_v57  ;;  %vm372_vm10 = vweird.f32 %v752_v53 }
  0xc0   : > { %v355_v58 = vmul.f32 %v628_v43, %v354_v50  ;;  %v379_v36 = vor.u32 1.1754944e-38, %v378_v20  ;;  %vm402_vm12 = vweird.f32 %v754_v57  ;;  %vm377_vm13 = vcmp.eq.f32.partialorder %v376_v19, 8.507059e+37 }
  0xc1   : > { %v385_v60 = vmul.f32 %v630_v45, %v384_v56  ;;  %v409_v47 = vor.u32 1.1754944e-38, %v408_v28  ;;  %vm407_vm15 = vcmp.eq.f32.partialorder %v406_v31, 8.507059e+37  ;;  %637 = vpow2.f32 %v460_v16 }
  0xc2   : > { %v356_v62 = vadd.f32 %v628_v43, %v355_v58  ;;  %vm332_vm0 = vcmp.ge.f32.partialorder %v727_v23, 0.0  ;;  %vm334_vm1 = vcmp.ge.f32.partialorder %v730_v24, 0.0  ;;  %v324_v20 = vmul.f32 0.5, %v722_v21 }
  0xc3   : > { %v386_v0 = vadd.f32 %v630_v45, %v385_v60  ;;  %v632_v7 = vpop.eup %631  ;;  %v453_v60 = vmul.f32 %v449_v34, %v745_v42  ;;  %vm333_vm2 = vcmp.ge.f32.partialorder %v739_v39, 0.0 }
  0xc4   : > { %v360_v1 = vsel %vm359_vm3, %v628_v43, %v356_v62  ;;  %v634_v10 = vpop.eup %633  ;;  %v368_v12 = vmul.f32 %v632_v7, %v752_v53  ;;  %vm373_vm8 = vweird.f32 %v632_v7  ;;  %vm335_vm3 = vcmp.ge.f32.partialorder %v742_v40, 0.0 }
  0xc5   : > { %v365_v4 = vsel %vm362_vm5, %v364_v63, %v360_v1  ;;  %v390_v6 = vsel %vm389_vm6, %v630_v45, %v386_v0  ;;  %v398_v14 = vmul.f32 %v634_v10, %v754_v57  ;;  %vm403_vm9 = vweird.f32 %v634_v10  ;;  %vm374_vm11 = vmor %vm372_vm10, %vm373_vm8  ;;  %v636_v43 = vpop.eup %635 }
  0xc6   : > { %v412_v8 = vmul.f32 1.0614054, %v365_v4  ;;  %v395_v9 = vsel %vm392_vm7, %v394_v2, %v390_v6  ;;  %v369_v17 = vsub.f32 1.0, %v368_v12  ;;  %vm404_vm14 = vmor %vm402_vm12, %vm403_vm9  ;;  %v455_v0 = vmul.f32 %v451_v54, %v748_v44 }
  0xc7   : > { %v414_v11 = vmul.f32 1.0614054, %v395_v9  ;;  %v399_v25 = vsub.f32 1.0, %v398_v14  ;;  %v638_v6 = vpop.eup %637 }
  0xc8   : > { %v416_v13 = vadd.f32 -1.4531521, %v412_v8  ;;  %v370_v27 = vmul.f32 %v632_v7, %v369_v17  ;;  %v458_v8 = vmul.f32 1.442695, %v453_v60  ;;  %v462_v42 = vmul.f32 1.442695, %v455_v0 }
  0xc9   : > { %v418_v15 = vadd.f32 -1.4531521, %v414_v11  ;;  %v400_v30 = vmul.f32 %v634_v10, %v399_v25 }
  0xca   : > { %v420_v18 = vmul.f32 %v416_v13, %v365_v4  ;;  %v371_v33 = vadd.f32 %v632_v7, %v370_v27  ;;  %639 = vpow2.f32 %v458_v8 }
  0xcb   : > { %v422_v26 = vmul.f32 %v418_v15, %v395_v9  ;;  %v401_v41 = vadd.f32 %v634_v10, %v400_v30  ;;  %v651_v15 = vmov -1.0   ;;  %641 = vpow2.f32 %v462_v42 }
  0xcc   : > { %v424_v29 = vadd.f32 1.4214138, %v420_v18  ;;  %v375_v46 = vsel %vm374_vm11, %v632_v7, %v371_v33  ;;  %v336_v44 = vsel %vm332_vm0, 1.0, %v651_v15  ;;  %v338_v17 = vsel %vm334_vm1, 1.0, %v651_v15 }
  0xcd   : > { %v426_v32 = vadd.f32 1.4214138, %v422_v26  ;;  %v380_v49 = vsel %vm377_vm13, %v379_v36, %v375_v46  ;;  %v405_v50 = vsel %vm404_vm14, %v634_v10, %v401_v41  ;;  %v326_v26 = vmul.f32 0.5, %v724_v22 }
  0xce   : > { %v428_v35 = vmul.f32 %v424_v29, %v365_v4  ;;  %v413_v52 = vmul.f32 1.0614054, %v380_v49  ;;  %v410_v53 = vsel %vm407_vm15, %v409_v47, %v405_v50  ;;  %v339_v46 = vsel %vm335_vm3, 1.0, %v651_v15 }
  0xcf   : > { %v430_v45 = vmul.f32 %v426_v32, %v395_v9  ;;  %v415_v56 = vmul.f32 1.0614054, %v410_v53  ;;  %v327_v50 = vmul.f32 0.5, %v736_v38 }
  0xd0   : > { %v432_v48 = vadd.f32 -0.28449672, %v428_v35  ;;  %v417_v58 = vadd.f32 -1.4531521, %v413_v52  ;;  %v640_v33 = vpop.eup %639 }
  0xd1   : > { %v434_v51 = vadd.f32 -0.28449672, %v430_v45  ;;  %v419_v61 = vadd.f32 -1.4531521, %v415_v56  ;;  %v642_v35 = vpop.eup %641 }
  0xd2   : > { %v436_v55 = vmul.f32 %v432_v48, %v365_v4  ;;  %v421_v63 = vmul.f32 %v417_v58, %v380_v49  ;;  %v325_v48 = vmul.f32 0.5, %v734_v37 }
  0xd3   : > { %v438_v57 = vmul.f32 %v434_v51, %v395_v9  ;;  %v423_v2 = vmul.f32 %v419_v61, %v410_v53 }
  0xd4   : > { %v440_v59 = vadd.f32 0.2548296, %v436_v55  ;;  %v425_v5 = vadd.f32 1.4214138, %v421_v63 }
  0xd5   : > { %v442_v62 = vadd.f32 0.2548296, %v438_v57  ;;  %v427_v10 = vadd.f32 1.4214138, %v423_v2 }
  0xd6   : > { %v444_v1 = vmul.f32 %v440_v59, %v365_v4  ;;  %v429_v12 = vmul.f32 %v425_v5, %v380_v49 }
  0xd7   : > { %v446_v3 = vmul.f32 %v442_v62, %v395_v9  ;;  %v431_v14 = vmul.f32 %v427_v10, %v410_v53 }
  0xd8   : > { %v464_v7 = vmul.f32 %v636_v43, %v444_v1  ;;  %v433_v16 = vadd.f32 -0.28449672, %v429_v12  ;;  %v337_v43 = vsel %vm333_vm2, 1.0, %v651_v15 }
  0xd9   : > { %v466_v11 = vmul.f32 %v638_v6, %v446_v3  ;;  %v435_v18 = vadd.f32 -0.28449672, %v431_v14 }
  0xda   : > { %v468_v13 = vsub.f32 1.0, %v464_v7  ;;  %v437_v19 = vmul.f32 %v433_v16, %v380_v49 }
  0xdb   : > { %v470_v4 = vsub.f32 1.0, %v466_v11  ;;  %v439_v25 = vmul.f32 %v435_v18, %v410_v53 }
  0xdc   : > { %v472_v9 = vmul.f32 %v468_v13, %v336_v44  ;;  %v441_v28 = vadd.f32 0.2548296, %v437_v19 }
  0xdd   : > { %v474_v23 = vmul.f32 %v470_v4, %v338_v17  ;;  %v443_v30 = vadd.f32 0.2548296, %v439_v25 }
  0xde   : > { %v476_v24 = vadd.f32 1.0, %v472_v9  ;;  %v445_v32 = vmul.f32 %v441_v28, %v380_v49 }
  0xdf   : > { %v478_v27 = vadd.f32 1.0, %v474_v23  ;;  %v447_v34 = vmul.f32 %v443_v30, %v410_v53 }
  0xe0   : > { %v480_v29 = vmul.f32 %v476_v24, %v324_v20  ;;  %v465_v21 = vmul.f32 %v640_v33, %v445_v32 }
  0xe1   : > { %v482_v31 = vmul.f32 %v478_v27, %v326_v26  ;;  %v467_v36 = vmul.f32 %v642_v35, %v447_v34 }
  0xe2   : > { %484 = vst [vmem:[%s221_s20] sm:$0xff] %v480_v29  ;;  %v469_v41 = vsub.f32 1.0, %v465_v21 }
  0xe3   : > { %486 = vst [vmem:[%s221_s20 + $0x10] sm:$0xff] %v482_v31  ;;  %v471_v22 = vsub.f32 1.0, %v467_v36 }
  0xe4   : > { %v473_v45 = vmul.f32 %v469_v41, %v337_v43 }
  0xe5   : > { %v475_v47 = vmul.f32 %v471_v22, %v339_v46 }
  0xe6   : > { %v477_v49 = vadd.f32 1.0, %v473_v45 }
  0xe7   : > { %v479_v51 = vadd.f32 1.0, %v475_v47 }
  0xe8   : > { %v481_v52 = vmul.f32 %v477_v49, %v325_v48 }
  0xe9   : > { %v483_v53 = vmul.f32 %v479_v51, %v327_v50 }
  0xea   : > { %485 = vst [vmem:[%s221_s20 + $0x8] sm:$0xff] %v481_v52 }
  0xeb   : > { %487 = vst [vmem:[%s221_s20 + $0x18] sm:$0xff] %v483_v53 }
  0xec PF: > { %s14_s15 = sadd.s32 1, %s649_s15  }
  0xed   : > { %p11_p4 = scmp.ge.s32.totalorder %s14_s15, 6  }
  0xef   :  { %13 = sbr.rel (!%p11_p4) target bundleno = 1 (0x1), region = 69 }

// kernel: fno2d_forward.14
= control target key start
LH: loop header
LB: loop body
LE: loop exit
PB: predicated region body
PF: predicated region fallthrough
CT: control target
= control target key end

     0   :  { %s499_s15 = smov 0   ;;  %s546_s0 = inlined_call_operand.vmem [shape: f32[128,128], index: 0, kind: input, shape index: {}]   ;;  %s547_s1 = inlined_call_operand.vmem [shape: bf16[128,128], index: 1, kind: input, shape index: {}]   ;;  %s548_s2 = inlined_call_operand.vmem [shape: f32[1,128], index: 2, kind: input, shape index: {}]   ;;  %s549_s3 = inlined_call_operand.vmem [shape: f32[128,128], index: 3, kind: input, shape index: {}]   ;;  %s550_s4 = inlined_call_operand.vmem [shape: f32[128,128], index: 4, kind: output, shape index: {}]  }
   0x1 LB: > { %s396_s16 = sadd.s32 4294967295, %s472_s15   ;;  %p400_p0 = scmp.ge.s32.totalorder %s472_s15, 1  ;;  %s472_s15 = sphi %s499_s15, %s14_s15  }
   0x2   : > { %p174_p1 = scmp.lt.s32.totalorder %s472_s15, 5 }
   0x4   : > { %p175_p2 = pnand %p400_p0, %p174_p1 }
   0x5   : > { %s401_s23 = sshll.u32 (!%p175_p2), %s396_s16, 2 }
   0x6   : > { %178 = sbr.rel (%p175_p2) target bundleno = 183 (0xb7), region = 36  ;;  %p206_p3 = scmp.lt.s32.totalorder (!%p175_p2), %s401_s23, 15 }
   0xb   : > { %v448_v0 = vld [vmem:[%s547_s1 + $0x38] sm:$0xff]  ;;  %v447_v1 = vld [vmem:[%s547_s1 + $0x30] sm:$0xff]  ;;  %v446_v2 = vld [vmem:[%s547_s1 + $0x28] sm:$0xff]  ;;  %s552_s23 = smov (!%p206_p3, %s401_s23), 15 }
   0xc   : > { %297 = vmatpush.bf16.msra.mxu0 %v448_v0  ;;  %449 = vmatpush.bf16.msra.mxu1 %v448_v0  ;;  %v445_v3 = vld [vmem:[%s547_s1 + $0x20] sm:$0xff]  ;;  %v444_v4 = vld [vmem:[%s547_s1 + $0x18] sm:$0xff]  ;;  %v443_v5 = vld [vmem:[%s547_s1 + $0x10] sm:$0xff]  ;;  %s402_s30 = sshll.u32 %s552_s23, 3 }
   0xd   : > { %v442_v6 = vld [vmem:[%s547_s1 + $0x8] sm:$0xff]  ;;  %s209_s9 = scalar_lea.vmem %s546_s0, %s402_s30  ;;  %v441_v7 = vld [vmem:[%s547_s1] sm:$0xff]  ;;  %s215_s14 = scalar_lea.vmem %s549_s3, %s402_s30 }
   0xe   : > { %v223_v8 = vld [vmem:[%s209_s9] sm:$0xff]  ;;  %v224_v9 = vld [vmem:[%s209_s9 + $0x8] sm:$0xff]  ;;  %v225_v10 = vld [vmem:[%s209_s9 + $0x10] sm:$0xff]  ;;  %s221_s20 = scalar_lea.vmem %s550_s4, %s402_s30 }
   0xf   : > { %v226_v11 = vld [vmem:[%s209_s9 + $0x18] sm:$0xff]  ;;  %v227_v12 = vpack.c.bf16 %v224_v9, %v223_v8  ;;  %v465_v14 = vld [vmem:[%s548_s2] ss:$0 sm:$0xff]  ;;  %v318_v18 = vld [vmem:[%s215_s14 + $0x10] sm:$0xff] }
  0x10   : > { %298 = vmatpush.bf16.msra.mxu0 %v447_v1  ;;  %450 = vmatpush.bf16.msra.mxu1 %v447_v1  ;;  %v228_v13 = vpack.c.bf16 %v226_v11, %v225_v10  ;;  %v316_v16 = vld [vmem:[%s215_s14] sm:$0xff]  ;;  %v317_v24 = vld [vmem:[%s215_s14 + $0x8] sm:$0xff]  ;;  %v319_v26 = vld [vmem:[%s215_s14 + $0x18] sm:$0xff] }
  0x14   : > { %299 = vmatpush.bf16.msra.mxu0 %v446_v2  ;;  %451 = vmatpush.bf16.msra.mxu1 %v446_v2 }
  0x18   : > { %300 = vmatpush.bf16.msra.mxu0 %v445_v3  ;;  %452 = vmatpush.bf16.msra.mxu1 %v445_v3 }
  0x1c   : > { %301 = vmatpush.bf16.msra.mxu0 %v444_v4  ;;  %453 = vmatpush.bf16.msra.mxu1 %v444_v4 }
  0x20   : > { %302 = vmatpush.bf16.msra.mxu0 %v443_v5  ;;  %454 = vmatpush.bf16.msra.mxu1 %v443_v5 }
  0x24   : > { %303 = vmatpush.bf16.msra.mxu0 %v442_v6  ;;  %455 = vmatpush.bf16.msra.mxu1 %v442_v6 }
  0x28   : > { %304 = vmatpush.bf16.msra.mxu0 %v441_v7  ;;  %456 = vmatpush.bf16.msra.mxu1 %v441_v7 }
  0x2b   : > { %305 = vmatmul.bf16.vlgmr.msra.gmra.mxu0 %v227_v12  ;;  %310 = vmatmul.bf16.vlgmr.msra.gmra.mxu1 %v228_v13 }
  0xa8   : > { %v306_v15 = vpop.f32.mrf.mxu0  ;;  %v311_v17 = vpop.f32.mrf.mxu1 }
  0xa9   : > { %v307_v19 = vadd.f32 %v465_v14, %v306_v15  ;;  %v312_v20 = vadd.f32 %v465_v14, %v311_v17 }
  0xab   : > { %v320_v21 = vadd.f32 %v316_v16, %v307_v19  ;;  %v322_v22 = vadd.f32 %v318_v18, %v312_v20 }
  0xad   : > { %324 = vst [vmem:[%s221_s20] sm:$0xff] %v320_v21 }
  0xae   : > { %326 = vst [vmem:[%s221_s20 + $0x10] sm:$0xff] %v322_v22 }
  0xb0   : > { %v308_v23 = vpop.f32.mrf.mxu0  ;;  %v313_v25 = vpop.f32.mrf.mxu1 }
  0xb1   : > { %v309_v27 = vadd.f32 %v465_v14, %v308_v23  ;;  %v314_v28 = vadd.f32 %v465_v14, %v313_v25 }
  0xb3   : > { %v321_v29 = vadd.f32 %v317_v24, %v309_v27  ;;  %v323_v30 = vadd.f32 %v319_v26, %v314_v28 }
  0xb5   : > { %325 = vst [vmem:[%s221_s20 + $0x8] sm:$0xff] %v321_v29 }
  0xb6   : > { %327 = vst [vmem:[%s221_s20 + $0x18] sm:$0xff] %v323_v30 }
  0xb7 PF: > { %s14_s15 = sadd.s32 1, %s472_s15  }
  0xb8   : > { %p11_p4 = scmp.ge.s32.totalorder %s14_s15, 6  }
  0xba   :  { %13 = sbr.rel (!%p11_p4) target bundleno = 1 (0x1), region = 69 }

// kernel: fno2d_forward.15
= control target key start
LH: loop header
LB: loop body
LE: loop exit
PB: predicated region body
PF: predicated region fallthrough
CT: control target
= control target key end

     0   :  { %s1181_s18 = smov 0   ;;  %s1731_s0 = inlined_call_operand.vmem [shape: f32[128,128], index: 0, kind: input, shape index: {}]   ;;  %s1732_s1 = inlined_call_operand.vmem [shape: bf16[128,256], index: 1, kind: input, shape index: {}]   ;;  %s1733_s2 = inlined_call_operand.vmem [shape: f32[1,256], index: 2, kind: input, shape index: {}]   ;;  %s1734_s3 = inlined_call_operand.vmem [shape: bf16[256,8], index: 3, kind: input, shape index: {}]   ;;  %s1735_s4 = inlined_call_operand.vmem [shape: f32[1,8], index: 4, kind: input, shape index: {}]   ;;  %s1736_s5 = inlined_call_operand.vmem [shape: f32[128,8], index: 5, kind: output, shape index: {}]  }
   0x1 LB: > { %s929_s19 = sadd.s32 4294967295, %s1148_s18   ;;  %p933_p0 = scmp.ge.s32.totalorder %s1148_s18, 1  ;;  %s1148_s18 = sphi %s1181_s18, %s15_s18  }
   0x2   : > { %p188_p1 = scmp.lt.s32.totalorder %s1148_s18, 5 }
   0x4   : > { %p189_p2 = pnand %p933_p0, %p188_p1 }
   0x5   : > { %s934_s29 = sshll.u32 (!%p189_p2), %s929_s19, 2 }
   0x6   : > { %192 = sbr.rel (%p189_p2) target bundleno = 412 (0x19c), region = 40  ;;  %p217_p3 = scmp.lt.s32.totalorder (!%p189_p2), %s934_s29, 15 }
   0xb   : > { %v996_v0 = vld [vmem:[%s1732_s1 + $0x70] sm:$0xf]  ;;  %v1083_v1 = vld [vmem:[%s1732_s1 + $0x74] sm:$0xf0]  ;;  %v1082_v2 = vld [vmem:[%s1732_s1 + $0x74] sm:$0xf] }
   0xc   : > { %v997_v3 = vor.u32 %v1083_v1, %v996_v0  ;;  %v998_v4 = vld [vmem:[%s1732_s1 + $0x78] sm:$0xf0]  ;;  %v988_v5 = vld [vmem:[%s1732_s1 + $0x60] sm:$0xf]  ;;  %v1081_v6 = vld [vmem:[%s1732_s1 + $0x64] sm:$0xf0] }
   0xd   : > { %v1001_v7 = vor.u32 %v1082_v2, %v998_v4  ;;  %v1080_v8 = vld [vmem:[%s1732_s1 + $0x64] sm:$0xf]  ;;  %v990_v9 = vld [vmem:[%s1732_s1 + $0x68] sm:$0xf0]  ;;  %v989_v10 = vor.u32 %v1081_v6, %v988_v5  ;;  %v980_v12 = vld [vmem:[%s1732_s1 + $0x50] sm:$0xf] }
   0xe   : > { %336 = vmatpush.bf16.msra.mxu0 %v997_v3  ;;  %v993_v11 = vor.u32 %v1080_v8, %v990_v9  ;;  %v1079_v13 = vld [vmem:[%s1732_s1 + $0x54] sm:$0xf0]  ;;  %v1078_v14 = vld [vmem:[%s1732_s1 + $0x54] sm:$0xf]  ;;  %v982_v15 = vld [vmem:[%s1732_s1 + $0x58] sm:$0xf0] }
   0xf   : > { %355 = vmatpush.bf16.msra.mxu1 %v1001_v7  ;;  %v981_v16 = vor.u32 %v1079_v13, %v980_v12  ;;  %v985_v17 = vor.u32 %v1078_v14, %v982_v15  ;;  %v972_v18 = vld [vmem:[%s1732_s1 + $0x40] sm:$0xf]  ;;  %v1077_v19 = vld [vmem:[%s1732_s1 + $0x44] sm:$0xf0]  ;;  %v1076_v20 = vld [vmem:[%s1732_s1 + $0x44] sm:$0xf] }
  0x10   : > { %v974_v21 = vld [vmem:[%s1732_s1 + $0x48] sm:$0xf0]  ;;  %v973_v22 = vor.u32 %v1077_v19, %v972_v18  ;;  %v964_v24 = vld [vmem:[%s1732_s1 + $0x30] sm:$0xf]  ;;  %v1075_v25 = vld [vmem:[%s1732_s1 + $0x34] sm:$0xf0] }
  0x11   : > { %v977_v23 = vor.u32 %v1076_v20, %v974_v21  ;;  %v1074_v26 = vld [vmem:[%s1732_s1 + $0x34] sm:$0xf]  ;;  %v966_v27 = vld [vmem:[%s1732_s1 + $0x38] sm:$0xf0]  ;;  %v965_v28 = vor.u32 %v1075_v25, %v964_v24  ;;  %v956_v30 = vld [vmem:[%s1732_s1 + $0x20] sm:$0xf] }
  0x12   : > { %337 = vmatpush.bf16.msra.mxu0 %v989_v10  ;;  %v969_v29 = vor.u32 %v1074_v26, %v966_v27  ;;  %v1073_v31 = vld [vmem:[%s1732_s1 + $0x24] sm:$0xf0]  ;;  %v1072_v32 = vld [vmem:[%s1732_s1 + $0x24] sm:$0xf]  ;;  %v958_v33 = vld [vmem:[%s1732_s1 + $0x28] sm:$0xf0] }
  0x13   : > { %356 = vmatpush.bf16.msra.mxu1 %v993_v11  ;;  %s1758_s29 = smov (!%p217_p3, %s934_s29), 15  ;;  %v957_v34 = vor.u32 %v1073_v31, %v956_v30  ;;  %v961_v35 = vor.u32 %v1072_v32, %v958_v33  ;;  %v948_v36 = vld [vmem:[%s1732_s1 + $0x10] sm:$0xf]  ;;  %v1071_v37 = vld [vmem:[%s1732_s1 + $0x14] sm:$0xf0]  ;;  %v1089_v20 = vld [vmem:[%s1734_s3 + $0x28] sm:$0xff] }
  0x14   : > { %v1070_v38 = vld [vmem:[%s1732_s1 + $0x14] sm:$0xf]  ;;  %v950_v39 = vld [vmem:[%s1732_s1 + $0x18] sm:$0xf0]  ;;  %s935_s6 = sshll.u32 %s1758_s29, 3  ;;  %v949_v40 = vor.u32 %v1071_v37, %v948_v36  ;;  %v1097_v21 = vld [vmem:[%s1734_s3 + $0x68] sm:$0xff] }
  0x15   : > { %v953_v41 = vor.u32 %v1070_v38, %v950_v39  ;;  %v940_v42 = vld [vmem:[%s1732_s1] sm:$0xf]  ;;  %v1069_v43 = vld [vmem:[%s1732_s1 + $0x4] sm:$0xf0]  ;;  %s220_s19 = scalar_lea.vmem %s1731_s0, %s935_s6  ;;  %v1068_v44 = vld [vmem:[%s1732_s1 + $0x4] sm:$0xf]  ;;  %s226_s12 = scalar_lea.vmem %s1736_s5, %s935_s6 }
  0x16   : > { %338 = vmatpush.bf16.msra.mxu0 %v981_v16  ;;  %v942_v45 = vld [vmem:[%s1732_s1 + $0x8] sm:$0xf0]  ;;  %v941_v46 = vor.u32 %v1069_v43, %v940_v42  ;;  %v228_v47 = vld [vmem:[%s220_s19] sm:$0xff]  ;;  %v230_v51 = vld [vmem:[%s220_s19 + $0x10] sm:$0xff]  ;;  %v1150_v39 = vmov -1.0  }
  0x17   : > { %357 = vmatpush.bf16.msra.mxu1 %v985_v17  ;;  %v229_v48 = vld [vmem:[%s220_s19 + $0x8] sm:$0xff]  ;;  %v945_v49 = vor.u32 %v1068_v44, %v942_v45  ;;  %v231_v52 = vld [vmem:[%s220_s19 + $0x18] sm:$0xff]  ;;  %v250_v54 = vld [vmem:[%s1733_s2] sm:$0x3] }
  0x18   : > { %v232_v50 = vpack.c.bf16 %v229_v48, %v228_v47  ;;  %v233_v53 = vpack.c.bf16 %v231_v52, %v230_v51  ;;  %v1298_v55 = vperm.slane %v250_v54, 0  ;;  %v1300_v56 = vperm.slane %v250_v54, 1  ;;  %v1091_v2 = vld [vmem:[%s1734_s3 + $0x38] sm:$0xff]  ;;  %v1090_v12 = vld [vmem:[%s1734_s3 + $0x30] sm:$0xff] }
  0x19   : > { %v1099_v3 = vld [vmem:[%s1734_s3 + $0x78] sm:$0xff]  ;;  %830 = vmatpush.bf16.msra.mxu2 %v1091_v2  ;;  %v1098_v13 = vld [vmem:[%s1734_s3 + $0x70] sm:$0xff] }
  0x1a   : > { %339 = vmatpush.bf16.msra.mxu0 %v973_v22  ;;  %849 = vmatpush.bf16.msra.mxu3 %v1099_v3  ;;  %v1087_v42 = vld [vmem:[%s1734_s3 + $0x18] sm:$0xff] }
  0x1b   : > { %358 = vmatpush.bf16.msra.mxu1 %v977_v23  ;;  %v1095_v43 = vld [vmem:[%s1734_s3 + $0x58] sm:$0xff] }
  0x1d   : > { %831 = vmatpush.bf16.msra.mxu2 %v1090_v12 }
  0x1e   : > { %340 = vmatpush.bf16.msra.mxu0 %v965_v28  ;;  %850 = vmatpush.bf16.msra.mxu3 %v1098_v13 }
  0x1f   : > { %359 = vmatpush.bf16.msra.mxu1 %v969_v29 }
  0x21   : > { %832 = vmatpush.bf16.msra.mxu2 %v1089_v20 }
  0x22   : > { %341 = vmatpush.bf16.msra.mxu0 %v957_v34  ;;  %851 = vmatpush.bf16.msra.mxu3 %v1097_v21  ;;  %v1088_v34 = vld [vmem:[%s1734_s3 + $0x20] sm:$0xff] }
  0x23   : > { %360 = vmatpush.bf16.msra.mxu1 %v961_v35  ;;  %v1096_v35 = vld [vmem:[%s1734_s3 + $0x60] sm:$0xff] }
  0x25   : > { %833 = vmatpush.bf16.msra.mxu2 %v1088_v34 }
  0x26   : > { %342 = vmatpush.bf16.msra.mxu0 %v949_v40  ;;  %852 = vmatpush.bf16.msra.mxu3 %v1096_v35 }
  0x27   : > { %361 = vmatpush.bf16.msra.mxu1 %v953_v41 }
  0x29   : > { %834 = vmatpush.bf16.msra.mxu2 %v1087_v42  ;;  %v1084_v42 = vld [vmem:[%s1734_s3] sm:$0xff] }
  0x2a   : > { %343 = vmatpush.bf16.msra.mxu0 %v941_v46  ;;  %853 = vmatpush.bf16.msra.mxu3 %v1095_v43  ;;  %v1092_v43 = vld [vmem:[%s1734_s3 + $0x40] sm:$0xff] }
  0x2b   : > { %362 = vmatpush.bf16.msra.mxu1 %v945_v49 }
  0x2d   : > { %344 = vmatmul.bf16.vlgmr.msra.gmra.mxu0 %v232_v50 }
  0x2e   : > { %363 = vmatmul.bf16.vlgmr.msra.gmra.mxu1 %v232_v50 }
  0x3d   : > { %349 = vmatmul.bf16.gmra.mxu0 %v233_v53 }
  0x3e   : > { %368 = vmatmul.bf16.gmra.mxu1 %v233_v53 }
  0xaa   : > { %v345_v57 = vpop.f32.mrf.mxu0 }
  0xab   : > { %v346_v58 = vadd.f32 %v345_v57, %v1298_v55  ;;  %v364_v59 = vpop.f32.mrf.mxu1 }
  0xac   : > { %v1304_v60 = vadd.f32 %v364_v59, %v1300_v56  ;;  %v1086_v59 = vld [vmem:[%s1734_s3 + $0x10] sm:$0xff] }
  0xad   : > { %v382_v61 = vmul.f32 0.70710677, %v346_v58  ;;  %v1368_v38 = vmul.f32 0.5, %v346_v58  ;;  %835 = vmatpush.bf16.msra.mxu2 %v1086_v59 }
  0xae   : > { %v383_v62 = vmul.f32 0.70710677, %v1304_v60 }
  0xaf   : > { %v406_v63 = vand.u32 2147483647, %v382_v61  ;;  %vm390_vm0 = vcmp.ge.f32.partialorder %v382_v61, 0.0  ;;  %v1094_v61 = vld [vmem:[%s1734_s3 + $0x50] sm:$0xff] }
  0xb0   : > { %v407_v0 = vand.u32 2147483647, %v383_v62  ;;  %vm391_vm1 = vcmp.ge.f32.partialorder %v383_v62, 0.0  ;;  %v1371_v40 = vsel %vm390_vm0, 1.0, %v1150_v39  ;;  %854 = vmatpush.bf16.msra.mxu3 %v1094_v61 }
  0xb1   : > { %v414_v1 = vmul.f32 0.3275911, %v406_v63  ;;  %v622_v10 = vsub.f32 0.0, %v406_v63  ;;  %v1382_v45 = vsel %vm391_vm1, 1.0, %v1150_v39 }
  0xb2   : > { %v415_v4 = vmul.f32 0.3275911, %v407_v0  ;;  %v347_v5 = vpop.f32.mrf.mxu0  ;;  %v623_v15 = vsub.f32 0.0, %v407_v0 }
  0xb3   : > { %v1313_v6 = vadd.f32 1.0, %v414_v1  ;;  %v348_v7 = vadd.f32 %v347_v5, %v1298_v55  ;;  %v366_v8 = vpop.f32.mrf.mxu1  ;;  %v630_v18 = vmul.f32 %v622_v10, %v406_v63 }
  0xb4   : > { %v1317_v9 = vadd.f32 %v366_v8, %v1300_v56  ;;  %v1320_v11 = vadd.f32 1.0, %v415_v4  ;;  %v631_v25 = vmul.f32 %v623_v15, %v407_v0 }
  0xb5   : > { %1110 = vrcp.f32 %v1313_v6  ;;  %v1328_v14 = vmul.f32 0.70710677, %v348_v7  ;;  %v638_v31 = vmul.f32 1.442695, %v630_v18  ;;  %v1384_v46 = vmul.f32 0.5, %v348_v7 }
  0xb6   : > { %v1331_v16 = vmul.f32 0.70710677, %v1317_v9  ;;  %1112 = vrcp.f32 %v1320_v11  ;;  %v640_v41 = vmul.f32 1.442695, %v631_v25  ;;  %vm435_vm3 = vweird.f32 %v1313_v6 }
  0xb7   : > { %v408_v17 = vand.u32 2147483647, %v1328_v14  ;;  %vm392_vm2 = vcmp.ge.f32.partialorder %v1328_v14, 0.0  ;;  %v439_v54 = vand.u32 2147483647, %v1313_v6  ;;  %v441_v62 = vand.u32 2147483648, %v1313_v6 }
  0xb8   : > { %v1336_v19 = vand.u32 2147483647, %v1331_v16  ;;  %vm393_vm4 = vcmp.ge.f32.partialorder %v1331_v16, 0.0  ;;  %vm450_vm9 = vweird.f32 %v1320_v11 }
  0xb9   : > { %v416_v22 = vmul.f32 0.3275911, %v408_v17  ;;  %v624_v36 = vsub.f32 0.0, %v408_v17  ;;  %vm1461_vm7 = vcmp.eq.f32.partialorder %v439_v54, 8.507059e+37  ;;  %v442_v35 = vor.u32 1.1754944e-38, %v441_v62 }
  0xba   : > { %v350_v23 = vpop.f32.mrf.mxu0  ;;  %v417_v26 = vmul.f32 0.3275911, %v1336_v19  ;;  %v625_v48 = vsub.f32 0.0, %v1336_v19 }
  0xbb   : > { %v1344_v24 = vpop.eup %1110  ;;  %v369_v27 = vpop.f32.mrf.mxu1  ;;  %v1349_v29 = vadd.f32 1.0, %v416_v22  ;;  %v1352_v30 = vadd.f32 %v350_v23, %v1298_v55  ;;  %v632_v51 = vmul.f32 %v624_v36, %v408_v17  ;;  %v1093_v22 = vld [vmem:[%s1734_s3 + $0x48] sm:$0xff] }
  0xbc   : > { %v431_v28 = vmul.f32 %v1344_v24, %v1313_v6  ;;  %v1354_v32 = vadd.f32 1.0, %v417_v26  ;;  %v1357_v33 = vadd.f32 %v369_v27, %v1300_v56  ;;  %v1366_v37 = vpop.eup %1112  ;;  %v633_v7 = vmul.f32 %v625_v48, %v1336_v19  ;;  %v1085_v19 = vld [vmem:[%s1734_s3 + $0x8] sm:$0xff]  ;;  %855 = vmatpush.bf16.msra.mxu3 %v1093_v22 }
  0xbd   : > { %1114 = vrcp.f32 %v1349_v29  ;;  %v1387_v47 = vmul.f32 0.70710677, %v1352_v30  ;;  %v446_v50 = vmul.f32 %v1366_v37, %v1320_v11  ;;  %v642_v12 = vmul.f32 1.442695, %v632_v51  ;;  %836 = vmatpush.bf16.msra.mxu2 %v1085_v19 }
  0xbe   : > { %1116 = vrcp.f32 %v1354_v32  ;;  %v432_v44 = vsub.f32 1.0, %v431_v28  ;;  %v1392_v49 = vmul.f32 0.70710677, %v1357_v33  ;;  %vm436_vm5 = vweird.f32 %v1344_v24 }
  0xbf   : > { %1118 = vpow2.f32 %v638_v31  ;;  %v410_v52 = vand.u32 2147483647, %v1387_v47  ;;  %v447_v10 = vsub.f32 1.0, %v446_v50  ;;  %v1456_v27 = vsel %vm393_vm4, 1.0, %v1150_v39  ;;  %vm1479_vm8 = vmor %vm435_vm3, %vm436_vm5 }
  0xc0   : > { %1120 = vpow2.f32 %v640_v41  ;;  %v1400_v57 = vand.u32 2147483647, %v1392_v49  ;;  %v433_v0 = vmul.f32 %v1344_v24, %v432_v44  ;;  %v644_v28 = vmul.f32 1.442695, %v633_v7  ;;  %856 = vmatpush.bf16.msra.mxu3 %v1092_v43 }
  0xc1   : > { %v418_v1 = vmul.f32 0.3275911, %v410_v52  ;;  %v626_v2 = vsub.f32 0.0, %v410_v52  ;;  %vm465_vm6 = vweird.f32 %v1349_v29  ;;  %v448_v36 = vmul.f32 %v1366_v37, %v447_v10  ;;  %837 = vmatpush.bf16.msra.mxu2 %v1084_v42 }
  0xc2   : > { %v352_v53 = vpop.f32.mrf.mxu0  ;;  %v419_v8 = vmul.f32 0.3275911, %v1400_v57  ;;  %v434_v25 = vadd.f32 %v1344_v24, %v433_v0  ;;  %vm480_vm11 = vweird.f32 %v1354_v32  ;;  %v469_v62 = vand.u32 2147483647, %v1349_v29 }
  0xc3   : > { %v1403_v58 = vadd.f32 %v352_v53, %v1298_v55  ;;  %v1412_v63 = vpop.eup %1114  ;;  %v1418_v55 = vsel %vm392_vm2, 1.0, %v1150_v39  ;;  %v371_v3 = vpop.f32.mrf.mxu1  ;;  %v1427_v13 = vadd.f32 1.0, %v418_v1  ;;  %v634_v18 = vmul.f32 %v626_v2, %v410_v52 }
  0xc4   : > { %v1420_v4 = vpop.eup %1116  ;;  %v461_v5 = vmul.f32 %v1412_v63, %v1349_v29  ;;  %v1434_v20 = vadd.f32 1.0, %v419_v8  ;;  %v1437_v21 = vadd.f32 %v371_v3, %v1300_v56  ;;  %v438_v52 = vsel %vm1479_vm8, %v1344_v24, %v434_v25 }
  0xc5   : > { %v1430_v14 = vmul.f32 0.70710677, %v1403_v58  ;;  %v1432_v15 = vpop.eup %1118  ;;  %v476_v23 = vmul.f32 %v1420_v4, %v1354_v32  ;;  %1122 = vrcp.f32 %v1427_v13  ;;  %v646_v41 = vmul.f32 1.442695, %v634_v18 }
  0xc6   : > { %v462_v17 = vsub.f32 1.0, %v461_v5  ;;  %v1450_v56 = vpop.eup %1120  ;;  %1124 = vrcp.f32 %v1434_v20  ;;  %v1467_v16 = vmul.f32 0.70710677, %v1437_v21  ;;  %vm466_vm10 = vweird.f32 %v1412_v63 }
  0xc7   : > { %v412_v31 = vand.u32 2147483647, %v1430_v14  ;;  %1126 = vpow2.f32 %v642_v12  ;;  %v477_v48 = vsub.f32 1.0, %v476_v23  ;;  %v471_v0 = vand.u32 2147483648, %v1349_v29  ;;  %vm1516_vm12 = vmor %vm465_vm6, %vm466_vm10 }
  0xc8   : > { %v463_v26 = vmul.f32 %v1412_v63, %v462_v17  ;;  %1128 = vpow2.f32 %v644_v28  ;;  %v1488_v53 = vand.u32 2147483647, %v1467_v16  ;;  %v1506_v3 = vsel %vm1461_vm7, %v442_v35, %v438_v52 }
  0xc9   : > { %v420_v50 = vmul.f32 0.3275911, %v412_v31  ;;  %v628_v51 = vsub.f32 0.0, %v412_v31  ;;  %1130 = vpow2.f32 %v646_v41  ;;  %v478_v5 = vmul.f32 %v1420_v4, %v477_v48 }
  0xca   : > { %v464_v54 = vadd.f32 %v1412_v63, %v463_v26  ;;  %v421_v2 = vmul.f32 0.3275911, %v1488_v53  ;;  %v472_v22 = vor.u32 1.1754944e-38, %v471_v0  ;;  %v550_v25 = vmul.f32 1.0614054, %v1506_v3 }
  0xcb   : > { %v1492_v6 = vpop.eup %1122  ;;  %v1495_v59 = vadd.f32 1.0, %v420_v50  ;;  %v636_v61 = vmul.f32 %v628_v51, %v412_v31  ;;  %v449_v29 = vadd.f32 %v1366_v37, %v448_v36  ;;  %vm495_vm13 = vweird.f32 %v1427_v13 }
  0xcc   : > { %v1499_v24 = vpop.eup %1124  ;;  %v491_v1 = vmul.f32 %v1492_v6, %v1427_v13  ;;  %v1522_v18 = vadd.f32 1.0, %v421_v2  ;;  %v468_v19 = vsel %vm1516_vm12, %v1412_v63, %v464_v54  ;;  %v627_v28 = vsub.f32 0.0, %v1400_v57 }
  0xcd   : > { %v506_v7 = vmul.f32 %v1499_v24, %v1434_v20  ;;  %1132 = vrcp.f32 %v1495_v59  ;;  %v650_v8 = vmul.f32 1.442695, %v636_v61  ;;  %v1520_v12 = vpop.eup %1126  ;;  %vm470_vm14 = vcmp.eq.f32.partialorder %v469_v62, 8.507059e+37 }
  0xce   : > { %v492_v17 = vsub.f32 1.0, %v491_v1  ;;  %v1529_v26 = vpop.eup %1128  ;;  %v1535_v34 = vsel %vm470_vm14, %v472_v22, %v468_v19  ;;  %v558_v63 = vadd.f32 -1.4531521, %v550_v25  ;;  %vm451_vm15 = vweird.f32 %v1366_v37 }
  0xcf   : > { %v507_v23 = vsub.f32 1.0, %v506_v7  ;;  %1134 = vpow2.f32 %v650_v8  ;;  %v1538_v35 = vpop.eup %1130  ;;  %v552_v41 = vmul.f32 1.0614054, %v1535_v34  ;;  %vm1546_vm0 = vmor %vm450_vm9, %vm451_vm15  ;;  %v454_v43 = vand.u32 2147483647, %v1320_v11 }
  0xd0   : > { %1136 = vrcp.f32 %v1522_v18  ;;  %v493_v31 = vmul.f32 %v1492_v6, %v492_v17  ;;  %v456_v44 = vand.u32 2147483648, %v1320_v11  ;;  %v566_v50 = vmul.f32 %v558_v63, %v1506_v3 }
  0xd1   : > { %v1541_v36 = vmul.f32 %v1499_v24, %v507_v23  ;;  %v453_v51 = vsel %vm1546_vm0, %v1366_v37, %v449_v29  ;;  %v479_v52 = vadd.f32 %v1420_v4, %v478_v5  ;;  %vm481_vm1 = vweird.f32 %v1420_v4 }
  0xd2   : > { %v560_v61 = vadd.f32 -1.4531521, %v552_v41  ;;  %vm455_vm2 = vcmp.eq.f32.partialorder %v454_v43, 8.507059e+37  ;;  %v457_v62 = vor.u32 1.1754944e-38, %v456_v44  ;;  %vm1564_vm3 = vmor %vm480_vm11, %vm481_vm1  ;;  %vm525_vm4 = vweird.f32 %v1495_v59 }
  0xd3   : > { %v1552_v48 = vpop.eup %1132  ;;  %v574_v37 = vadd.f32 1.4214138, %v566_v50  ;;  %v483_v1 = vsel %vm1564_vm3, %v1420_v4, %v479_v52  ;;  %v484_v2 = vand.u32 2147483647, %v1354_v32  ;;  %v486_v5 = vand.u32 2147483648, %v1354_v32 }
  0xd4   : > { %v521_v54 = vmul.f32 %v1552_v48, %v1495_v59  ;;  %v568_v10 = vmul.f32 %v560_v61, %v1535_v34  ;;  %v1579_v17 = vsel %vm455_vm2, %v457_v62, %v453_v51  ;;  %v494_v19 = vadd.f32 %v1492_v6, %v493_v31 }
  0xd5   : > { %v1568_v0 = vpop.eup %1134  ;;  %v582_v23 = vmul.f32 %v574_v37, %v1506_v3  ;;  %vm485_vm5 = vcmp.eq.f32.partialorder %v484_v2, 8.507059e+37  ;;  %v487_v4 = vor.u32 1.1754944e-38, %v486_v5  ;;  %v551_v32 = vmul.f32 1.0614054, %v1579_v17 }
  0xd6   : > { %v1576_v7 = vpop.eup %1136  ;;  %v522_v8 = vsub.f32 1.0, %v521_v54  ;;  %v576_v29 = vadd.f32 1.4214138, %v568_v10  ;;  %vm496_vm6 = vweird.f32 %v1492_v6  ;;  %vm510_vm7 = vweird.f32 %v1434_v20 }
  0xd7   : > { %v536_v22 = vmul.f32 %v1576_v7, %v1522_v18  ;;  %v590_v41 = vadd.f32 -0.28449672, %v582_v23  ;;  %v1589_v42 = vsel %vm485_vm5, %v487_v4, %v483_v1  ;;  %vm1593_vm8 = vmor %vm495_vm13, %vm496_vm6  ;;  %v499_v43 = vand.u32 2147483647, %v1427_v13 }
  0xd8   : > { %v523_v25 = vmul.f32 %v1552_v48, %v522_v8  ;;  %v584_v44 = vmul.f32 %v576_v29, %v1535_v34  ;;  %v553_v50 = vmul.f32 1.0614054, %v1589_v42  ;;  %v559_v51 = vadd.f32 -1.4531521, %v551_v32 }
  0xd9   : > { %v537_v63 = vsub.f32 1.0, %v536_v22  ;;  %v498_v52 = vsel %vm1593_vm8, %v1492_v6, %v494_v19  ;;  %v598_v61 = vmul.f32 %v590_v41, %v1506_v3  ;;  %vm1605_vm9 = vcmp.eq.f32.partialorder %v499_v43, 8.507059e+37 }
  0xda   : > { %v501_v11 = vand.u32 2147483648, %v1427_v13  ;;  %v592_v37 = vadd.f32 -0.28449672, %v584_v44  ;;  %v561_v1 = vadd.f32 -1.4531521, %v553_v50  ;;  %v567_v2 = vmul.f32 %v559_v51, %v1579_v17 }
  0xdb   : > { %v538_v54 = vmul.f32 %v1576_v7, %v537_v63  ;;  %v524_v5 = vadd.f32 %v1552_v48, %v523_v25  ;;  %v606_v8 = vadd.f32 0.2548296, %v598_v61  ;;  %vm526_vm10 = vweird.f32 %v1552_v48 }
  0xdc   : > { %v502_v10 = vor.u32 1.1754944e-38, %v501_v11  ;;  %v529_v6 = vand.u32 2147483647, %v1495_v59  ;;  %v600_v19 = vmul.f32 %v592_v37, %v1535_v34  ;;  %v569_v22 = vmul.f32 %v561_v1, %v1589_v42  ;;  %vm1618_vm11 = vmor %vm525_vm4, %vm526_vm10 }
  0xdd   : > { %v575_v23 = vadd.f32 1.4214138, %v567_v2  ;;  %v531_v4 = vand.u32 2147483648, %v1495_v59  ;;  %v614_v25 = vmul.f32 %v606_v8, %v1506_v3  ;;  %v528_v32 = vsel %vm1618_vm11, %v1552_v48, %v524_v5 }
  0xde   : > { %v1626_v29 = vsel %vm1605_vm9, %v502_v10, %v498_v52  ;;  %vm530_vm12 = vcmp.eq.f32.partialorder %v529_v6, 8.507059e+37  ;;  %v608_v63 = vadd.f32 0.2548296, %v600_v19  ;;  %v577_v41 = vadd.f32 1.4214138, %v569_v22 }
  0xdf   : > { %v583_v31 = vmul.f32 %v575_v23, %v1579_v17  ;;  %v532_v43 = vor.u32 1.1754944e-38, %v531_v4  ;;  %v654_v44 = vmul.f32 %v1432_v15, %v614_v25  ;;  %v554_v59 = vmul.f32 1.0614054, %v1626_v29 }
  0xe0   : > { %v509_v3 = vadd.f32 %v1499_v24, %v1541_v36  ;;  %vm511_vm13 = vweird.f32 %v1499_v24  ;;  %vm540_vm14 = vweird.f32 %v1522_v18  ;;  %v616_v50 = vmul.f32 %v608_v63, %v1535_v34 }
  0xe1   : > { %v585_v48 = vmul.f32 %v577_v41, %v1589_v42  ;;  %v591_v51 = vadd.f32 -0.28449672, %v583_v31  ;;  %v1640_v52 = vsel %vm530_vm12, %v532_v43, %v528_v32  ;;  %vm1644_vm15 = vmor %vm510_vm7, %vm511_vm13  ;;  %v662_v61 = vsub.f32 1.0, %v654_v44 }
  0xe2   : > { %v556_v36 = vmul.f32 1.0614054, %v1640_v52  ;;  %v562_v62 = vadd.f32 -1.4531521, %v554_v59  ;;  %v513_v11 = vsel %vm1644_vm15, %v1499_v24, %v509_v3  ;;  %v656_v34 = vmul.f32 %v1520_v12, %v616_v50 }
  0xe3   : > { %v593_v37 = vadd.f32 -0.28449672, %v585_v48  ;;  %v599_v1 = vmul.f32 %v591_v51, %v1579_v17  ;;  %v514_v2 = vand.u32 2147483647, %v1434_v20  ;;  %v670_v5 = vmul.f32 %v662_v61, %v1371_v40 }
  0xe4   : > { %v564_v8 = vadd.f32 -1.4531521, %v556_v36  ;;  %v570_v10 = vmul.f32 %v562_v62, %v1626_v29  ;;  %v516_v6 = vand.u32 2147483648, %v1434_v20  ;;  %v664_v19 = vsub.f32 1.0, %v656_v34 }
  0xe5   : > { %v601_v22 = vmul.f32 %v593_v37, %v1589_v42  ;;  %v607_v23 = vadd.f32 0.2548296, %v599_v1  ;;  %vm515_vm0 = vcmp.eq.f32.partialorder %v514_v2, 8.507059e+37  ;;  %v678_v24 = vadd.f32 1.0, %v670_v5 }
  0xe6   : > { %v572_v12 = vmul.f32 %v564_v8, %v1640_v52  ;;  %v578_v13 = vadd.f32 1.4214138, %v570_v10  ;;  %v517_v4 = vor.u32 1.1754944e-38, %v516_v6  ;;  %v672_v25 = vmul.f32 %v664_v19, %v1418_v55 }
  0xe7   : > { %v609_v32 = vadd.f32 0.2548296, %v601_v22  ;;  %v615_v40 = vmul.f32 %v607_v23, %v1579_v17  ;;  %v539_v63 = vadd.f32 %v1576_v7, %v538_v54  ;;  %v686_v41 = vmul.f32 %v678_v24, %v1368_v38 }
  0xe8   : > { %v580_v20 = vadd.f32 1.4214138, %v572_v12  ;;  %v586_v31 = vmul.f32 %v578_v13, %v1626_v29  ;;  %v1665_v43 = vsel %vm515_vm0, %v517_v4, %v513_v11  ;;  %v680_v44 = vadd.f32 1.0, %v672_v25 }
  0xe9   : > { %v617_v59 = vmul.f32 %v609_v32, %v1589_v42  ;;  %v655_v3 = vmul.f32 %v1450_v56, %v615_v40  ;;  %vm541_vm1 = vweird.f32 %v1576_v7  ;;  %v544_v38 = vand.u32 2147483647, %v1522_v18 }
  0xea   : > { %v588_v55 = vmul.f32 %v580_v20, %v1640_v52  ;;  %v594_v50 = vadd.f32 -0.28449672, %v586_v31  ;;  %vm1673_vm2 = vmor %vm540_vm14, %vm541_vm1  ;;  %v546_v54 = vand.u32 2147483648, %v1522_v18  ;;  %v688_v48 = vmul.f32 %v680_v44, %v1384_v46 }
  0xeb   : > { %v657_v42 = vmul.f32 %v1529_v26, %v617_v59  ;;  %v663_v56 = vsub.f32 1.0, %v655_v3  ;;  %v543_v51 = vsel %vm1673_vm2, %v1576_v7, %v539_v63  ;;  %vm545_vm3 = vcmp.eq.f32.partialorder %v544_v38, 8.507059e+37 }
  0xec   : > { %v596_v15 = vadd.f32 -0.28449672, %v588_v55  ;;  %v602_v61 = vmul.f32 %v594_v50, %v1626_v29  ;;  %v547_v36 = vor.u32 1.1754944e-38, %v546_v54  ;;  %v694_v62 = vpack.c.bf16 %v688_v48, %v686_v41 }
  0xed   : > { %v665_v11 = vsub.f32 1.0, %v657_v42  ;;  %v671_v34 = vmul.f32 %v663_v56, %v1382_v45  ;;  %v555_v18 = vmul.f32 1.0614054, %v1665_v43  ;;  %v629_v46 = vsub.f32 0.0, %v1488_v53 }
  0xee   : > { %v604_v26 = vmul.f32 %v596_v15, %v1640_v52  ;;  %v610_v37 = vadd.f32 0.2548296, %v602_v61  ;;  %v548_v1 = vsel %vm545_vm3, %v547_v36, %v543_v51  ;;  %838 = vmatmul.bf16.vlgmr.msra.gmra.mxu2 %v694_v62  ;;  %v375_v10 = vmul.f32 0.5, %v1304_v60 }
  0xef   : > { %v673_v7 = vmul.f32 %v665_v11, %v1456_v27  ;;  %v679_v2 = vadd.f32 1.0, %v671_v34  ;;  %v557_v5 = vmul.f32 1.0614054, %v548_v1  ;;  %v563_v8 = vadd.f32 -1.4531521, %v555_v18 }
  0xf0   : > { %v635_v45 = vmul.f32 %v627_v28, %v1400_v57  ;;  %v612_v6 = vadd.f32 0.2548296, %v604_v26  ;;  %v618_v19 = vmul.f32 %v610_v37, %v1626_v29  ;;  %v377_v22 = vmul.f32 0.5, %v1317_v9 }
  0xf1   : > { %v681_v23 = vadd.f32 1.0, %v673_v7  ;;  %v565_v24 = vadd.f32 -1.4531521, %v557_v5  ;;  %v571_v12 = vmul.f32 %v563_v8, %v1665_v43  ;;  %vm394_vm4 = vcmp.ge.f32.partialorder %v1387_v47, 0.0 }
  0xf2   : > { %v637_v27 = vmul.f32 %v629_v46, %v1488_v53  ;;  %v620_v13 = vmul.f32 %v612_v6, %v1640_v52  ;;  %v658_v60 = vmul.f32 %v1538_v35, %v618_v19  ;;  %v687_v4 = vmul.f32 %v679_v2, %v375_v10  ;;  %v1109_v10 = vld [vmem:[%s1735_s4] ss:$0 sm:$0xff] }
  0xf3   : > { %v689_v25 = vmul.f32 %v681_v23, %v377_v22  ;;  %v573_v57 = vmul.f32 %v565_v24, %v548_v1  ;;  %v579_v28 = vadd.f32 1.4214138, %v571_v12  ;;  %v648_v32 = vmul.f32 1.442695, %v635_v45 }
  0xf4   : > { %vm396_vm5 = vcmp.ge.f32.partialorder %v1430_v14, 0.0  ;;  %v660_v9 = vmul.f32 %v1568_v0, %v620_v13  ;;  %v666_v29 = vsub.f32 1.0, %v658_v60  ;;  %v402_v40 = vsel %vm394_vm4, 1.0, %v1150_v39 }
  0xf5   : > { %v695_v63 = vpack.c.bf16 %v689_v25, %v687_v4  ;;  %v581_v47 = vadd.f32 1.4214138, %v573_v57  ;;  %v587_v53 = vmul.f32 %v579_v28, %v1665_v43  ;;  %v652_v41 = vmul.f32 1.442695, %v637_v27 }
  0xf6   : > { %v668_v52 = vsub.f32 1.0, %v660_v9  ;;  %v674_v20 = vmul.f32 %v666_v29, %v402_v40  ;;  %v404_v35 = vsel %vm396_vm5, 1.0, %v1150_v39  ;;  %1138 = vpow2.f32 %v648_v32 }
  0xf7   : > { %857 = vmatmul.bf16.vlgmr.msra.gmra.mxu3 %v695_v63  ;;  %v589_v31 = vmul.f32 %v581_v47, %v548_v1  ;;  %v595_v44 = vadd.f32 -0.28449672, %v587_v53  ;;  %v378_v55 = vmul.f32 0.5, %v1352_v30  ;;  %v380_v50 = vmul.f32 0.5, %v1403_v58 }
  0xf8   : > { %v676_v59 = vmul.f32 %v668_v52, %v404_v35  ;;  %v682_v14 = vadd.f32 1.0, %v674_v20  ;;  %1140 = vpow2.f32 %v652_v41  ;;  %vm395_vm6 = vcmp.ge.f32.partialorder %v1392_v49, 0.0 }
  0xf9   : > { %v597_v3 = vadd.f32 -0.28449672, %v589_v31  ;;  %v603_v0 = vmul.f32 %v595_v44, %v1665_v43  ;;  %vm397_vm7 = vcmp.ge.f32.partialorder %v1467_v16, 0.0  ;;  %v403_v34 = vsel %vm395_vm6, 1.0, %v1150_v39 }
  0xfa   : > { %v684_v17 = vadd.f32 1.0, %v676_v59  ;;  %v690_v48 = vmul.f32 %v682_v14, %v378_v55  ;;  %v405_v26 = vsel %vm397_vm7, 1.0, %v1150_v39  ;;  %v379_v7 = vmul.f32 0.5, %v1357_v33 }
  0xfb   : > { %v605_v38 = vmul.f32 %v597_v3, %v548_v1  ;;  %v611_v54 = vadd.f32 0.2548296, %v603_v0  ;;  %v381_v49 = vmul.f32 0.5, %v1437_v21  ;;  %vm868_vm8 = vcmask 64512  }
  0xfc   : > { %v692_v42 = vmul.f32 %v684_v17, %v380_v50  ;;  %v1139_v15 = vpop.eup %1138 }
  0xfd   : > { %v613_v56 = vadd.f32 0.2548296, %v605_v38  ;;  %v619_v51 = vmul.f32 %v611_v54, %v1665_v43 }
  0xfe   : > { %v696_v61 = vpack.c.bf16 %v692_v42, %v690_v48  ;;  %v1141_v11 = vpop.eup %1140 }
  0xff   : > { %v621_v36 = vmul.f32 %v613_v56, %v548_v1  ;;  %v659_v62 = vmul.f32 %v1139_v15, %v619_v51 }
 0x100   : > { %843 = vmatmul.bf16.gmra.mxu2 %v696_v61 }
 0x101   : > { %v661_v30 = vmul.f32 %v1141_v11, %v621_v36  ;;  %v667_v58 = vsub.f32 1.0, %v659_v62 }
 0x103   : > { %v669_v18 = vsub.f32 1.0, %v661_v30  ;;  %v675_v46 = vmul.f32 %v667_v58, %v403_v34 }
 0x105   : > { %v677_v43 = vmul.f32 %v669_v18, %v405_v26  ;;  %v683_v37 = vadd.f32 1.0, %v675_v46 }
 0x107   : > { %v685_v1 = vadd.f32 1.0, %v677_v43  ;;  %v691_v2 = vmul.f32 %v683_v37, %v379_v7 }
 0x109   : > { %v693_v5 = vmul.f32 %v685_v1, %v381_v49 }
 0x10b   : > { %v697_v8 = vpack.c.bf16 %v693_v5, %v691_v2 }
 0x10d   : > { %862 = vmatmul.bf16.gmra.mxu3 %v697_v8 }
 0x171   : > { %v839_v16 = vpop.f32.mrf.mxu2 }
 0x172   : > { %v840_v45 = vadd.f32 %v1109_v10, %v839_v16 }
 0x179   : > { %v841_v21 = vpop.f32.mrf.mxu2 }
 0x17a   : > { %v858_v39 = vpop.f32.mrf.mxu3  ;;  %v842_v6 = vadd.f32 %v1109_v10, %v841_v21 }
 0x17b   : > { %v859_v33 = vadd.f32 %v858_v39, %v840_v45 }
 0x17d   : > { %869 = vst.msk [vmem:[%s226_s12] sm:$0xff] %vm868_vm8, %v859_v33 }
 0x182   : > { %v860_v19 = vpop.f32.mrf.mxu3 }
 0x183   : > { %v861_v22 = vadd.f32 %v860_v19, %v842_v6  ;;  %v844_v23 = vpop.f32.mrf.mxu2 }
 0x184   : > { %v845_v24 = vadd.f32 %v1109_v10, %v844_v23 }
 0x185   : > { %870 = vst.msk [vmem:[%s226_s12 + $0x8] sm:$0xff] %vm868_vm8, %v861_v22 }
 0x18b   : > { %v846_v13 = vpop.f32.mrf.mxu2 }
 0x18c   : > { %v847_v60 = vadd.f32 %v1109_v10, %v846_v13 }
 0x190   : > { %v863_v12 = vpop.f32.mrf.mxu3 }
 0x191   : > { %v864_v27 = vadd.f32 %v863_v12, %v845_v24 }
 0x193   : > { %871 = vst.msk [vmem:[%s226_s12 + $0x10] sm:$0xff] %vm868_vm8, %v864_v27 }
 0x198   : > { %v865_v4 = vpop.f32.mrf.mxu3 }
 0x199   : > { %v866_v25 = vadd.f32 %v865_v4, %v847_v60 }
 0x19b   : > { %872 = vst.msk [vmem:[%s226_s12 + $0x18] sm:$0xff] %vm868_vm8, %v866_v25 }
 0x19c PF: > { %s15_s18 = sadd.s32 1, %s1148_s18  }
 0x19d   : > { %p12_p4 = scmp.ge.s32.totalorder %s15_s18, 6  }
 0x19f   :  { %14 = sbr.rel (!%p12_p4) target bundleno = 1 (0x1), region = 70 }

</bundles_post_ra>
